<compile_context>
chip_gen: v5e
topology: v5e:2x2
jax: 0.10.0
libtpu: 0.0.40
codegen_flags: <defaults>
</compile_context>

<pallas_src>
import functools

import jax
import jax.numpy as jnp
from jax import lax
from jax.experimental import pallas as pl
from jax.experimental.pallas import tpu as pltpu


# ----------------------------------------------------------------------------
# Pallas kernel: ONE direction of a bidirectional LSTM layer, one time chunk
# per grid step.
#
# Grid: (2, n_chunks) = (direction, time_chunk).
#   gx_ref  : (Tc, B, 4H) bf16  precomputed x @ W_ih^T + b for THIS direction
#                               (lane-block d of the (T, B, 8H) projection),
#                               PyTorch gate order [i, f, g, o].
#   whh_ref : (H, 4H)     bf16  recurrent weights of this direction.
#   y_ref   : (Tc, B, H)  bf16  hidden states written at their original time
#                               rows (same chunk index map as gx).
#   h_scr / c_scr : (B, H) f32  recurrent state carried across time chunks.
#
# The fwd direction walks chunk rows 0..Tc-1; the bwd direction gets its
# chunks in reversed order from the index_map and walks rows Tc-1..0.
# ----------------------------------------------------------------------------
def bilstm_dir_kernel(gx_ref, whh_ref, y_ref, h_scr, c_scr):
    Tc, B, G4 = gx_ref.shape
    H = G4 // 4
    d = pl.program_id(0)          # 0 = forward, 1 = backward
    c = pl.program_id(1)          # time-chunk step within this direction

    @pl.when(c == 0)
    def _():                      # fresh state at the start of each direction
        h_scr[...] = jnp.zeros_like(h_scr)
        c_scr[...] = jnp.zeros_like(c_scr)

    whh = whh_ref[...]            # (H, 4H) bf16, resident across the chunk

    def step(s, carry):
        h, cs = carry                                  # (B, H) f32 each
        # fwd: r = s ; bwd: r = Tc - 1 - s
        r = s * (1 - 2 * d) + d * (Tc - 1)
        gates = gx_ref[r].astype(jnp.float32) + jnp.dot(
            h.astype(whh.dtype), whh, preferred_element_type=jnp.float32)
        # Sliced activations: one transcendental per lane (no jnp.where double-eval).
        i_g = jax.nn.sigmoid(gates[:, 0 * H:1 * H])
        f_g = jax.nn.sigmoid(gates[:, 1 * H:2 * H])
        g_g = jnp.tanh(gates[:, 2 * H:3 * H])
        o_g = jax.nn.sigmoid(gates[:, 3 * H:4 * H])
        c_new = f_g * cs + i_g * g_g
        h_new = o_g * jnp.tanh(c_new)
        y_ref[r] = h_new.astype(y_ref.dtype)
        return h_new, c_new

    unroll = Tc if Tc <= 16 else 8     # LLO visibility across the serial recurrence
    h_fin, c_fin = lax.fori_loop(0, Tc, step, (h_scr[...], c_scr[...]),
                                 unroll=unroll)
    h_scr[...] = h_fin
    c_scr[...] = c_fin


# ----------------------------------------------------------------------------
# Wrapper helpers.
# ----------------------------------------------------------------------------
def _pick_t_chunk(T, B, H):
    """Largest divisor of T whose (gx + y) chunk stays within ~8 MiB."""
    row_bytes = B * (4 * H + H) * 2          # bf16 gx row + bf16 y row
    cap = max(1, min(T, 512, (8 << 20) // max(row_bytes, 1)))
    for tc in range(cap, 0, -1):
        if T % tc == 0:
            return tc
    return 1


def _vmem_limit_bytes(t_chunk, B, H):
    gx_chunk = t_chunk * B * 4 * H * 2       # bf16
    y_chunk = t_chunk * B * H * 2            # bf16
    whh = 2 * H * 4 * H * 2                  # bf16 (both directions)
    scratch = 2 * B * max(H, 128) * 4        # f32 h/c scratch (lane-padded)
    need = 2 * (gx_chunk + y_chunk + whh) + scratch   # x2: double buffers
    return int(min(64 << 20, max(8 << 20, 2 * need)))


def bilstm_layer_recurrence(gx, whh):
    """gx: (T, B, 8H) bf16 ; whh: (2, H, 4H) bf16 -> y: (2, T, B, H) bf16."""
    T, B, G8 = gx.shape
    H = G8 // 8
    if (4 * H) % 128 != 0:
        raise ValueError("embed_dim must be a multiple of 32 for lane-aligned "
                         "per-direction gate blocks")
    t_chunk = _pick_t_chunk(T, B, H)
    nc = T // t_chunk

    def chunk_idx(d, c):
        # forward: c ; backward: nc - 1 - c (walk the time chunks in reverse)
        return c * (1 - 2 * d) + d * (nc - 1)

    gx_spec = pl.BlockSpec((t_chunk, B, 4 * H),
                           lambda d, c: (chunk_idx(d, c), 0, d))
    whh_spec = pl.BlockSpec((None, H, 4 * H), lambda d, c: (d, 0, 0))
    y_spec = pl.BlockSpec((None, t_chunk, B, H),
                          lambda d, c: (d, chunk_idx(d, c), 0, 0))

    return pl.pallas_call(
        bilstm_dir_kernel,
        out_shape=jax.ShapeDtypeStruct((2, T, B, H), jnp.bfloat16),
        grid_spec=pltpu.PrefetchScalarGridSpec(
            num_scalar_prefetch=0,
            grid=(2, nc),
            in_specs=[gx_spec, whh_spec],
            out_specs=y_spec,
            scratch_shapes=[pltpu.VMEM((B, H), jnp.float32),
                            pltpu.VMEM((B, H), jnp.float32)],
        ),
        compiler_params=pltpu.CompilerParams(
            dimension_semantics=("parallel", "arbitrary"),
            vmem_limit_bytes=_vmem_limit_bytes(t_chunk, B, H)),
    )(gx, whh)


def project_inputs(h, lp):
    """Hoisted input projection x @ W_ih^T + b for BOTH directions.

    h is either (T, B, Din) dense features (first layer) or (2, T, B, H) — the
    previous biLSTM layer output, consumed without any transpose by splitting
    the 2H-row weight into its fwd/bwd halves.
    Returns (T, B, 8H) bf16 with lanes [fwd i f g o | bwd i f g o].
    """
    w = lp["wih"]                                   # (Din, 8H) bf16
    if h.ndim == 3:
        T, B, Din = h.shape
        proj = jnp.dot(h.reshape(T * B, Din).astype(jnp.bfloat16), w,
                       preferred_element_type=jnp.float32)
    else:
        _, T, B, H = h.shape
        proj = (jnp.dot(h[0].reshape(T * B, H), w[:H],
                        preferred_element_type=jnp.float32)
                + jnp.dot(h[1].reshape(T * B, H), w[H:],
                          preferred_element_type=jnp.float32))
    proj = proj + lp["bias"]
    return proj.reshape(T, B, -1).astype(jnp.bfloat16)


def bilstm_forward(packed_params, x):
    """x: (B, T, E) batch_first -> (B, T, 2H) f32, PyTorch nn.LSTM semantics."""
    B0, T, _ = x.shape
    Bp = ((B0 + 7) // 8) * 8                         # pad batch to >=8 sublanes
    h = jnp.transpose(x, (1, 0, 2)).astype(jnp.float32)      # time-major (T, B, E)
    if Bp != B0:
        h = jnp.pad(h, ((0, 0), (0, Bp - B0), (0, 0)))
    for lp in packed_params:
        gx = project_inputs(h, lp)                   # (T, Bp, 8H) bf16
        h = bilstm_layer_recurrence(gx, lp["whh"])   # (2, T, Bp, H) bf16
    H = h.shape[-1]
    out = jnp.transpose(h, (2, 1, 0, 3)).reshape(Bp, T, 2 * H)   # [fwd | bwd]
    return out[:B0].astype(jnp.float32)


def ner_model_forward(packed_params, x, tags):
    """NERModel.forward: LSTM features then SCRF loss.

    The SCRF class is not defined in the provided source, so only the LSTM
    feature extraction (== NERModel.test) is implemented here.
    """
    feats = bilstm_forward(packed_params, x)
    # TODO(synk): SCRF loss over (feats, tags) — SCRF definition not provided in model.py.
    del tags
    return feats


# ----------------------------------------------------------------------------
# Parameter construction (deterministic, mimics nn.LSTM's U(-1/sqrt(H), 1/sqrt(H)))
# and one-time packing into the kernel's weight layout.
# ----------------------------------------------------------------------------
def init_lstm_params(key, embed_dim, num_layers=2):
    H = embed_dim
    k = 1.0 / jnp.sqrt(jnp.float32(H))
    params = []
    for layer in range(num_layers):
        din = embed_dim if layer == 0 else 2 * embed_dim
        layer_params = {}
        for direction in ("fwd", "bwd"):
            key, k1, k2, k3, k4 = jax.random.split(key, 5)
            w_ih = jax.random.uniform(k1, (4 * H, din), jnp.float32, -k, k)
            w_hh = jax.random.uniform(k2, (4 * H, H), jnp.float32, -k, k)
            b_ih = jax.random.uniform(k3, (4 * H,), jnp.float32, -k, k)
            b_hh = jax.random.uniform(k4, (4 * H,), jnp.float32, -k, k)
            layer_params[direction] = dict(
                w_ih=w_ih,                 # (4H, Din), PyTorch layout
                w_hh=w_hh,                 # (4H, H)
                bias=b_ih + b_hh,          # (4H,)
            )
        params.append(layer_params)
    return params


def pack_lstm_params(raw_params):
    """Pack raw (PyTorch-layout) params once into the kernel layout."""
    packed = []
    for lp in raw_params:
        wih = jnp.concatenate([lp["fwd"]["w_ih"], lp["bwd"]["w_ih"]], axis=0).T
        bias = jnp.concatenate([lp["fwd"]["bias"], lp["bwd"]["bias"]], axis=0)
        whh = jnp.stack([lp["fwd"]["w_hh"].T, lp["bwd"]["w_hh"].T], axis=0)
        packed.append(dict(wih=wih.astype(jnp.bfloat16),     # (Din, 8H)
                           bias=bias.astype(jnp.float32),    # (8H,)
                           whh=whh.astype(jnp.bfloat16)))    # (2, H, 4H)
    return packed


# ----------------------------------------------------------------------------
# Matched-precision pure-JAX reference (lax.scan per direction) for checking
# the Pallas biLSTM: bf16 matmuls with f32 accumulate, bf16-rounded gx and
# bf16-rounded layer outputs, mirroring the kernel's precision choices.
# ----------------------------------------------------------------------------
def _ref_lstm_direction(x_tm, w_ih, w_hh, bias, reverse):
    T, B, _ = x_tm.shape
    H = w_hh.shape[1]
    gx = (jnp.dot(x_tm.reshape(T * B, -1).astype(jnp.bfloat16),
                  w_ih.T.astype(jnp.bfloat16),
                  preferred_element_type=jnp.float32) + bias)
    gx = gx.astype(jnp.bfloat16).astype(jnp.float32).reshape(T, B, 4 * H)
    gxs = gx[::-1] if reverse else gx
    whh_T = w_hh.T.astype(jnp.bfloat16)

    def step(carry, g_t):
        h, c = carry
        gates = g_t + jnp.dot(h.astype(jnp.bfloat16), whh_T,
                              preferred_element_type=jnp.float32)
        i = jax.nn.sigmoid(gates[:, 0 * H:1 * H])
        f = jax.nn.sigmoid(gates[:, 1 * H:2 * H])
        g = jnp.tanh(gates[:, 2 * H:3 * H])
        o = jax.nn.sigmoid(gates[:, 3 * H:4 * H])
        c = f * c + i * g
        h = o * jnp.tanh(c)
        return (h, c), h

    init = (jnp.zeros((B, H), jnp.float32), jnp.zeros((B, H), jnp.float32))
    _, ys = lax.scan(step, init, gxs)
    return ys[::-1] if reverse else ys


def _ref_bilstm(params, x):
    h = jnp.transpose(x, (1, 0, 2)).astype(jnp.float32)
    for lp in params:
        y_f = _ref_lstm_direction(h, lp["fwd"]["w_ih"], lp["fwd"]["w_hh"],
                                  lp["fwd"]["bias"], reverse=False)
        y_b = _ref_lstm_direction(h, lp["bwd"]["w_ih"], lp["bwd"]["w_hh"],
                                  lp["bwd"]["bias"], reverse=True)
        h = jnp.concatenate([y_f, y_b], axis=-1)
        h = h.astype(jnp.bfloat16).astype(jnp.float32)   # kernel stores y in bf16
    return jnp.transpose(h, (1, 0, 2))


if __name__ == "__main__":
    # Small shapes implied by the module: batch=2, seq=8, embed_dim=32.
    B, T, E = 2, 8, 32
    key = jax.random.PRNGKey(0)
    k_params, k_x, k_tags = jax.random.split(key, 3)

    raw_params = init_lstm_params(k_params, E)
    packed_params = pack_lstm_params(raw_params)     # packed once, reused per call
    x = jax.random.normal(k_x, (B, T, E), jnp.float32)
    tags = jax.random.randint(k_tags, (B, T), 0, 5)   # placeholder tag ids

    out = jax.jit(functools.partial(ner_model_forward, packed_params))(x, tags)
    out = jax.block_until_ready(out)

    ref = _ref_bilstm(raw_params, x)
    assert out.shape == (B, T, 2 * E)
    assert jnp.allclose(out, ref, atol=2e-2, rtol=2e-2), "Pallas biLSTM mismatch"

    print("KERNEL_OK")
</pallas_src>

<mosaic_0001>
module attributes {stable_mosaic.version = 11 : i64} {
  func.func @bilstm_dir_kernel(%arg0: i32, %arg1: i32, %arg2: memref<8x8x128xbf16, #tpu.memory_space<vmem>>, %arg3: memref<1x32x128xbf16, #tpu.memory_space<vmem>>, %arg4: memref<1x8x8x32xbf16, #tpu.memory_space<vmem>>, %arg5: memref<8x32xf32, #tpu.memory_space<vmem>>, %arg6: memref<8x32xf32, #tpu.memory_space<vmem>>) attributes {dimension_semantics = [#tpu.dimension_semantics<parallel>, #tpu.dimension_semantics<arbitrary>], iteration_bounds = array<i64: 2, 1>, scalar_prefetch = 0 : i64, scratch_operands = 2 : i64, tpu.core_type = #tpu.core_type<tc>, window_params = [{transform_indices = @transform_0, window_bounds = array<i64: 8, 8, 128>}, {transform_indices = @transform_1, window_bounds = array<i64: 1, 32, 128>}, {transform_indices = @transform_2, window_bounds = array<i64: 1, 8, 8, 32>}]} {
    %c0_i32 = arith.constant 0 : i32
    %0 = arith.cmpi eq, %arg1, %c0_i32 : i32
    %1 = arith.extui %0 : i1 to i32
    %c0_i32_0 = arith.constant 0 : i32
    %2 = arith.cmpi ne, %1, %c0_i32_0 : i32
    scf.if %2 {
      %cst_107 = arith.constant 0.000000e+00 : f32
      %345 = vector.broadcast %cst_107 : f32 to vector<8x32xf32>
      %c0_108 = arith.constant 0 : index
      %c0_109 = arith.constant 0 : index
      %346 = vector.load %arg5[%c0_108, %c0_109] : memref<8x32xf32, #tpu.memory_space<vmem>>, vector<8x32xf32>
      tpu.vector_store %arg5[%c0_108, %c0_109], %345 {strides = array<i32>} : memref<8x32xf32, #tpu.memory_space<vmem>>, vector<8x32xf32>,
      %cst_110 = arith.constant 0.000000e+00 : f32
      %347 = vector.broadcast %cst_110 : f32 to vector<8x32xf32>
      %c0_111 = arith.constant 0 : index
      %c0_112 = arith.constant 0 : index
      %348 = vector.load %arg6[%c0_111, %c0_112] : memref<8x32xf32, #tpu.memory_space<vmem>>, vector<8x32xf32>
      tpu.vector_store %arg6[%c0_111, %c0_112], %347 {strides = array<i32>} : memref<8x32xf32, #tpu.memory_space<vmem>>, vector<8x32xf32>,
    } else {
    }
    %c0 = arith.constant 0 : index
    %c0_1 = arith.constant 0 : index
    %c0_2 = arith.constant 0 : index
    %3 = vector.load %arg3[%c0, %c0_1, %c0_2] : memref<1x32x128xbf16, #tpu.memory_space<vmem>>, vector<1x32x128xbf16>
    %4 = vector.shape_cast %3 : vector<1x32x128xbf16> to vector<32x128xbf16>
    %c0_3 = arith.constant 0 : index
    %c0_4 = arith.constant 0 : index
    %5 = vector.load %arg5[%c0_3, %c0_4] : memref<8x32xf32, #tpu.memory_space<vmem>>, vector<8x32xf32>
    %c0_5 = arith.constant 0 : index
    %c0_6 = arith.constant 0 : index
    %6 = vector.load %arg6[%c0_5, %c0_6] : memref<8x32xf32, #tpu.memory_space<vmem>>, vector<8x32xf32>
    %c0_i32_7 = arith.constant 0 : i32
    %c2_i32 = arith.constant 2 : i32
    %7 = arith.muli %c2_i32, %arg0 : i32
    %c1_i32 = arith.constant 1 : i32
    %8 = arith.subi %c1_i32, %7 : i32
    %9 = arith.muli %c0_i32_7, %8 : i32
    %c7_i32 = arith.constant 7 : i32
    %10 = arith.muli %arg0, %c7_i32 : i32
    %11 = arith.addi %9, %10 : i32
    %12 = arith.index_cast %11 : i32 to index
    %c0_8 = arith.constant 0 : index
    %c0_9 = arith.constant 0 : index
    %13 = vector.load %arg2[%12, %c0_8, %c0_9] : memref<8x8x128xbf16, #tpu.memory_space<vmem>>, vector<1x8x128xbf16>
    %14 = vector.shape_cast %13 : vector<1x8x128xbf16> to vector<8x128xbf16>
    %15 = arith.extf %14 : vector<8x128xbf16> to vector<8x128xf32>
    %16 = arith.truncf %5 : vector<8x32xf32> to vector<8x32xbf16>
    %cst = arith.constant dense<0.000000e+00> : vector<8x128xf32>
    %17 = tpu.matmul %16, %4, %cst {dimension_numbers = #tpu.dot_dimension_numbers<[1], [0], [0], [1], [0, 0, 1, 1], [], []>} : vector<8x32xbf16>, vector<32x128xbf16>, vector<8x128xf32> -> vector<8x128xf32>
    %18 = arith.addf %15, %17 : vector<8x128xf32>
    %19 = vector.extract_strided_slice %18 {offsets = [0, 0], sizes = [8, 32], strides = [1, 1]} : vector<8x128xf32> to vector<8x32xf32>
    %20 = arith.negf %19 : vector<8x32xf32>
    %21 = math.exp %20 : vector<8x32xf32>
    %cst_10 = arith.constant 1.000000e+00 : f32
    %22 = vector.broadcast %cst_10 : f32 to vector<8x32xf32>
    %23 = arith.addf %22, %21 : vector<8x32xf32>
    %24 = arith.divf %22, %23 : vector<8x32xf32>
    %25 = vector.extract_strided_slice %18 {offsets = [0, 32], sizes = [8, 32], strides = [1, 1]} : vector<8x128xf32> to vector<8x32xf32>
    %26 = arith.negf %25 : vector<8x32xf32>
    %27 = math.exp %26 : vector<8x32xf32>
    %cst_11 = arith.constant 1.000000e+00 : f32
    %28 = vector.broadcast %cst_11 : f32 to vector<8x32xf32>
    %29 = arith.addf %28, %27 : vector<8x32xf32>
    %30 = arith.divf %28, %29 : vector<8x32xf32>
    %31 = vector.extract_strided_slice %18 {offsets = [0, 64], sizes = [8, 32], strides = [1, 1]} : vector<8x128xf32> to vector<8x32xf32>
    %32 = math.tanh %31 : vector<8x32xf32>
    %33 = vector.extract_strided_slice %18 {offsets = [0, 96], sizes = [8, 32], strides = [1, 1]} : vector<8x128xf32> to vector<8x32xf32>
    %34 = arith.negf %33 : vector<8x32xf32>
    %35 = math.exp %34 : vector<8x32xf32>
    %cst_12 = arith.constant 1.000000e+00 : f32
    %36 = vector.broadcast %cst_12 : f32 to vector<8x32xf32>
    %37 = arith.addf %36, %35 : vector<8x32xf32>
    %38 = arith.divf %36, %37 : vector<8x32xf32>
    %39 = arith.mulf %30, %6 : vector<8x32xf32>
    %40 = arith.mulf %24, %32 : vector<8x32xf32>
    %41 = arith.addf %39, %40 : vector<8x32xf32>
    %42 = math.tanh %41 : vector<8x32xf32>
    %43 = arith.mulf %38, %42 : vector<8x32xf32>
    %44 = arith.truncf %43 : vector<8x32xf32> to vector<8x32xbf16>
    %c0_13 = arith.constant 0 : index
    %45 = arith.index_cast %11 : i32 to index
    %c0_14 = arith.constant 0 : index
    %c0_15 = arith.constant 0 : index
    %46 = vector.load %arg4[%c0_13, %45, %c0_14, %c0_15] : memref<1x8x8x32xbf16, #tpu.memory_space<vmem>>, vector<1x1x8x32xbf16>
    %47 = vector.shape_cast %46 : vector<1x1x8x32xbf16> to vector<8x32xbf16>
    %48 = vector.shape_cast %44 : vector<8x32xbf16> to vector<1x1x8x32xbf16>
    tpu.vector_store %arg4[%c0_13, %45, %c0_14, %c0_15], %48 {strides = array<i32>} : memref<1x8x8x32xbf16, #tpu.memory_space<vmem>>, vector<1x1x8x32xbf16>,
    %c1_i32_16 = arith.constant 1 : i32
    %c2_i32_17 = arith.constant 2 : i32
    %49 = arith.muli %c2_i32_17, %arg0 : i32
    %c1_i32_18 = arith.constant 1 : i32
    %50 = arith.subi %c1_i32_18, %49 : i32
    %51 = arith.muli %c1_i32_16, %50 : i32
    %c7_i32_19 = arith.constant 7 : i32
    %52 = arith.muli %arg0, %c7_i32_19 : i32
    %53 = arith.addi %51, %52 : i32
    %54 = arith.index_cast %53 : i32 to index
    %c0_20 = arith.constant 0 : index
    %c0_21 = arith.constant 0 : index
    %55 = vector.load %arg2[%54, %c0_20, %c0_21] : memref<8x8x128xbf16, #tpu.memory_space<vmem>>, vector<1x8x128xbf16>
    %56 = vector.shape_cast %55 : vector<1x8x128xbf16> to vector<8x128xbf16>
    %57 = arith.extf %56 : vector<8x128xbf16> to vector<8x128xf32>
    %58 = arith.truncf %43 : vector<8x32xf32> to vector<8x32xbf16>
    %cst_22 = arith.constant dense<0.000000e+00> : vector<8x128xf32>
    %59 = tpu.matmul %58, %4, %cst_22 {dimension_numbers = #tpu.dot_dimension_numbers<[1], [0], [0], [1], [0, 0, 1, 1], [], []>} : vector<8x32xbf16>, vector<32x128xbf16>, vector<8x128xf32> -> vector<8x128xf32>
    %60 = arith.addf %57, %59 : vector<8x128xf32>
    %61 = vector.extract_strided_slice %60 {offsets = [0, 0], sizes = [8, 32], strides = [1, 1]} : vector<8x128xf32> to vector<8x32xf32>
    %62 = arith.negf %61 : vector<8x32xf32>
    %63 = math.exp %62 : vector<8x32xf32>
    %cst_23 = arith.constant 1.000000e+00 : f32
    %64 = vector.broadcast %cst_23 : f32 to vector<8x32xf32>
    %65 = arith.addf %64, %63 : vector<8x32xf32>
    %66 = arith.divf %64, %65 : vector<8x32xf32>
    %67 = vector.extract_strided_slice %60 {offsets = [0, 32], sizes = [8, 32], strides = [1, 1]} : vector<8x128xf32> to vector<8x32xf32>
    %68 = arith.negf %67 : vector<8x32xf32>
    %69 = math.exp %68 : vector<8x32xf32>
    %cst_24 = arith.constant 1.000000e+00 : f32
    %70 = vector.broadcast %cst_24 : f32 to vector<8x32xf32>
    %71 = arith.addf %70, %69 : vector<8x32xf32>
    %72 = arith.divf %70, %71 : vector<8x32xf32>
    %73 = vector.extract_strided_slice %60 {offsets = [0, 64], sizes = [8, 32], strides = [1, 1]} : vector<8x128xf32> to vector<8x32xf32>
    %74 = math.tanh %73 : vector<8x32xf32>
    %75 = vector.extract_strided_slice %60 {offsets = [0, 96], sizes = [8, 32], strides = [1, 1]} : vector<8x128xf32> to vector<8x32xf32>
    %76 = arith.negf %75 : vector<8x32xf32>
    %77 = math.exp %76 : vector<8x32xf32>
    %cst_25 = arith.constant 1.000000e+00 : f32
    %78 = vector.broadcast %cst_25 : f32 to vector<8x32xf32>
    %79 = arith.addf %78, %77 : vector<8x32xf32>
    %80 = arith.divf %78, %79 : vector<8x32xf32>
    %81 = arith.mulf %72, %41 : vector<8x32xf32>
    %82 = arith.mulf %66, %74 : vector<8x32xf32>
    %83 = arith.addf %81, %82 : vector<8x32xf32>
    %84 = math.tanh %83 : vector<8x32xf32>
    %85 = arith.mulf %80, %84 : vector<8x32xf32>
    %86 = arith.truncf %85 : vector<8x32xf32> to vector<8x32xbf16>
    %c0_26 = arith.constant 0 : index
    %87 = arith.index_cast %53 : i32 to index
    %c0_27 = arith.constant 0 : index
    %c0_28 = arith.constant 0 : index
    %88 = vector.load %arg4[%c0_26, %87, %c0_27, %c0_28] : memref<1x8x8x32xbf16, #tpu.memory_space<vmem>>, vector<1x1x8x32xbf16>
    %89 = vector.shape_cast %88 : vector<1x1x8x32xbf16> to vector<8x32xbf16>
    %90 = vector.shape_cast %86 : vector<8x32xbf16> to vector<1x1x8x32xbf16>
    tpu.vector_store %arg4[%c0_26, %87, %c0_27, %c0_28], %90 {strides = array<i32>} : memref<1x8x8x32xbf16, #tpu.memory_space<vmem>>, vector<1x1x8x32xbf16>,
    %c2_i32_29 = arith.constant 2 : i32
    %c2_i32_30 = arith.constant 2 : i32
    %91 = arith.muli %c2_i32_30, %arg0 : i32
    %c1_i32_31 = arith.constant 1 : i32
    %92 = arith.subi %c1_i32_31, %91 : i32
    %93 = arith.muli %c2_i32_29, %92 : i32
    %c7_i32_32 = arith.constant 7 : i32
    %94 = arith.muli %arg0, %c7_i32_32 : i32
    %95 = arith.addi %93, %94 : i32
    %96 = arith.index_cast %95 : i32 to index
    %c0_33 = arith.constant 0 : index
    %c0_34 = arith.constant 0 : index
    %97 = vector.load %arg2[%96, %c0_33, %c0_34] : memref<8x8x128xbf16, #tpu.memory_space<vmem>>, vector<1x8x128xbf16>
    %98 = vector.shape_cast %97 : vector<1x8x128xbf16> to vector<8x128xbf16>
    %99 = arith.extf %98 : vector<8x128xbf16> to vector<8x128xf32>
    %100 = arith.truncf %85 : vector<8x32xf32> to vector<8x32xbf16>
    %cst_35 = arith.constant dense<0.000000e+00> : vector<8x128xf32>
    %101 = tpu.matmul %100, %4, %cst_35 {dimension_numbers = #tpu.dot_dimension_numbers<[1], [0], [0], [1], [0, 0, 1, 1], [], []>} : vector<8x32xbf16>, vector<32x128xbf16>, vector<8x128xf32> -> vector<8x128xf32>
    %102 = arith.addf %99, %101 : vector<8x128xf32>
    %103 = vector.extract_strided_slice %102 {offsets = [0, 0], sizes = [8, 32], strides = [1, 1]} : vector<8x128xf32> to vector<8x32xf32>
    %104 = arith.negf %103 : vector<8x32xf32>
    %105 = math.exp %104 : vector<8x32xf32>
    %cst_36 = arith.constant 1.000000e+00 : f32
    %106 = vector.broadcast %cst_36 : f32 to vector<8x32xf32>
    %107 = arith.addf %106, %105 : vector<8x32xf32>
    %108 = arith.divf %106, %107 : vector<8x32xf32>
    %109 = vector.extract_strided_slice %102 {offsets = [0, 32], sizes = [8, 32], strides = [1, 1]} : vector<8x128xf32> to vector<8x32xf32>
    %110 = arith.negf %109 : vector<8x32xf32>
    %111 = math.exp %110 : vector<8x32xf32>
    %cst_37 = arith.constant 1.000000e+00 : f32
    %112 = vector.broadcast %cst_37 : f32 to vector<8x32xf32>
    %113 = arith.addf %112, %111 : vector<8x32xf32>
    %114 = arith.divf %112, %113 : vector<8x32xf32>
    %115 = vector.extract_strided_slice %102 {offsets = [0, 64], sizes = [8, 32], strides = [1, 1]} : vector<8x128xf32> to vector<8x32xf32>
    %116 = math.tanh %115 : vector<8x32xf32>
    %117 = vector.extract_strided_slice %102 {offsets = [0, 96], sizes = [8, 32], strides = [1, 1]} : vector<8x128xf32> to vector<8x32xf32>
    %118 = arith.negf %117 : vector<8x32xf32>
    %119 = math.exp %118 : vector<8x32xf32>
    %cst_38 = arith.constant 1.000000e+00 : f32
    %120 = vector.broadcast %cst_38 : f32 to vector<8x32xf32>
    %121 = arith.addf %120, %119 : vector<8x32xf32>
    %122 = arith.divf %120, %121 : vector<8x32xf32>
    %123 = arith.mulf %114, %83 : vector<8x32xf32>
    %124 = arith.mulf %108, %116 : vector<8x32xf32>
    %125 = arith.addf %123, %124 : vector<8x32xf32>
    %126 = math.tanh %125 : vector<8x32xf32>
    %127 = arith.mulf %122, %126 : vector<8x32xf32>
    %128 = arith.truncf %127 : vector<8x32xf32> to vector<8x32xbf16>
    %c0_39 = arith.constant 0 : index
    %129 = arith.index_cast %95 : i32 to index
    %c0_40 = arith.constant 0 : index
    %c0_41 = arith.constant 0 : index
    %130 = vector.load %arg4[%c0_39, %129, %c0_40, %c0_41] : memref<1x8x8x32xbf16, #tpu.memory_space<vmem>>, vector<1x1x8x32xbf16>
    %131 = vector.shape_cast %130 : vector<1x1x8x32xbf16> to vector<8x32xbf16>
    %132 = vector.shape_cast %128 : vector<8x32xbf16> to vector<1x1x8x32xbf16>
    tpu.vector_store %arg4[%c0_39, %129, %c0_40, %c0_41], %132 {strides = array<i32>} : memref<1x8x8x32xbf16, #tpu.memory_space<vmem>>, vector<1x1x8x32xbf16>,
    %c3_i32 = arith.constant 3 : i32
    %c2_i32_42 = arith.constant 2 : i32
    %133 = arith.muli %c2_i32_42, %arg0 : i32
    %c1_i32_43 = arith.constant 1 : i32
    %134 = arith.subi %c1_i32_43, %133 : i32
    %135 = arith.muli %c3_i32, %134 : i32
    %c7_i32_44 = arith.constant 7 : i32
    %136 = arith.muli %arg0, %c7_i32_44 : i32
    %137 = arith.addi %135, %136 : i32
    %138 = arith.index_cast %137 : i32 to index
    %c0_45 = arith.constant 0 : index
    %c0_46 = arith.constant 0 : index
    %139 = vector.load %arg2[%138, %c0_45, %c0_46] : memref<8x8x128xbf16, #tpu.memory_space<vmem>>, vector<1x8x128xbf16>
    %140 = vector.shape_cast %139 : vector<1x8x128xbf16> to vector<8x128xbf16>
    %141 = arith.extf %140 : vector<8x128xbf16> to vector<8x128xf32>
    %142 = arith.truncf %127 : vector<8x32xf32> to vector<8x32xbf16>
    %cst_47 = arith.constant dense<0.000000e+00> : vector<8x128xf32>
    %143 = tpu.matmul %142, %4, %cst_47 {dimension_numbers = #tpu.dot_dimension_numbers<[1], [0], [0], [1], [0, 0, 1, 1], [], []>} : vector<8x32xbf16>, vector<32x128xbf16>, vector<8x128xf32> -> vector<8x128xf32>
    %144 = arith.addf %141, %143 : vector<8x128xf32>
    %145 = vector.extract_strided_slice %144 {offsets = [0, 0], sizes = [8, 32], strides = [1, 1]} : vector<8x128xf32> to vector<8x32xf32>
    %146 = arith.negf %145 : vector<8x32xf32>
    %147 = math.exp %146 : vector<8x32xf32>
    %cst_48 = arith.constant 1.000000e+00 : f32
    %148 = vector.broadcast %cst_48 : f32 to vector<8x32xf32>
    %149 = arith.addf %148, %147 : vector<8x32xf32>
    %150 = arith.divf %148, %149 : vector<8x32xf32>
    %151 = vector.extract_strided_slice %144 {offsets = [0, 32], sizes = [8, 32], strides = [1, 1]} : vector<8x128xf32> to vector<8x32xf32>
    %152 = arith.negf %151 : vector<8x32xf32>
    %153 = math.exp %152 : vector<8x32xf32>
    %cst_49 = arith.constant 1.000000e+00 : f32
    %154 = vector.broadcast %cst_49 : f32 to vector<8x32xf32>
    %155 = arith.addf %154, %153 : vector<8x32xf32>
    %156 = arith.divf %154, %155 : vector<8x32xf32>
    %157 = vector.extract_strided_slice %144 {offsets = [0, 64], sizes = [8, 32], strides = [1, 1]} : vector<8x128xf32> to vector<8x32xf32>
    %158 = math.tanh %157 : vector<8x32xf32>
    %159 = vector.extract_strided_slice %144 {offsets = [0, 96], sizes = [8, 32], strides = [1, 1]} : vector<8x128xf32> to vector<8x32xf32>
    %160 = arith.negf %159 : vector<8x32xf32>
    %161 = math.exp %160 : vector<8x32xf32>
    %cst_50 = arith.constant 1.000000e+00 : f32
    %162 = vector.broadcast %cst_50 : f32 to vector<8x32xf32>
    %163 = arith.addf %162, %161 : vector<8x32xf32>
    %164 = arith.divf %162, %163 : vector<8x32xf32>
    %165 = arith.mulf %156, %125 : vector<8x32xf32>
    %166 = arith.mulf %150, %158 : vector<8x32xf32>
    %167 = arith.addf %165, %166 : vector<8x32xf32>
    %168 = math.tanh %167 : vector<8x32xf32>
    %169 = arith.mulf %164, %168 : vector<8x32xf32>
    %170 = arith.truncf %169 : vector<8x32xf32> to vector<8x32xbf16>
    %c0_51 = arith.constant 0 : index
    %171 = arith.index_cast %137 : i32 to index
    %c0_52 = arith.constant 0 : index
    %c0_53 = arith.constant 0 : index
    %172 = vector.load %arg4[%c0_51, %171, %c0_52, %c0_53] : memref<1x8x8x32xbf16, #tpu.memory_space<vmem>>, vector<1x1x8x32xbf16>
    %173 = vector.shape_cast %172 : vector<1x1x8x32xbf16> to vector<8x32xbf16>
    %174 = vector.shape_cast %170 : vector<8x32xbf16> to vector<1x1x8x32xbf16>
    tpu.vector_store %arg4[%c0_51, %171, %c0_52, %c0_53], %174 {strides = array<i32>} : memref<1x8x8x32xbf16, #tpu.memory_space<vmem>>, vector<1x1x8x32xbf16>,
    %c4_i32 = arith.constant 4 : i32
    %c2_i32_54 = arith.constant 2 : i32
    %175 = arith.muli %c2_i32_54, %arg0 : i32
    %c1_i32_55 = arith.constant 1 : i32
    %176 = arith.subi %c1_i32_55, %175 : i32
    %177 = arith.muli %c4_i32, %176 : i32
    %c7_i32_56 = arith.constant 7 : i32
    %178 = arith.muli %arg0, %c7_i32_56 : i32
    %179 = arith.addi %177, %178 : i32
    %180 = arith.index_cast %179 : i32 to index
    %c0_57 = arith.constant 0 : index
    %c0_58 = arith.constant 0 : index
    %181 = vector.load %arg2[%180, %c0_57, %c0_58] : memref<8x8x128xbf16, #tpu.memory_space<vmem>>, vector<1x8x128xbf16>
    %182 = vector.shape_cast %181 : vector<1x8x128xbf16> to vector<8x128xbf16>
    %183 = arith.extf %182 : vector<8x128xbf16> to vector<8x128xf32>
    %184 = arith.truncf %169 : vector<8x32xf32> to vector<8x32xbf16>
    %cst_59 = arith.constant dense<0.000000e+00> : vector<8x128xf32>
    %185 = tpu.matmul %184, %4, %cst_59 {dimension_numbers = #tpu.dot_dimension_numbers<[1], [0], [0], [1], [0, 0, 1, 1], [], []>} : vector<8x32xbf16>, vector<32x128xbf16>, vector<8x128xf32> -> vector<8x128xf32>
    %186 = arith.addf %183, %185 : vector<8x128xf32>
    %187 = vector.extract_strided_slice %186 {offsets = [0, 0], sizes = [8, 32], strides = [1, 1]} : vector<8x128xf32> to vector<8x32xf32>
    %188 = arith.negf %187 : vector<8x32xf32>
    %189 = math.exp %188 : vector<8x32xf32>
    %cst_60 = arith.constant 1.000000e+00 : f32
    %190 = vector.broadcast %cst_60 : f32 to vector<8x32xf32>
    %191 = arith.addf %190, %189 : vector<8x32xf32>
    %192 = arith.divf %190, %191 : vector<8x32xf32>
    %193 = vector.extract_strided_slice %186 {offsets = [0, 32], sizes = [8, 32], strides = [1, 1]} : vector<8x128xf32> to vector<8x32xf32>
    %194 = arith.negf %193 : vector<8x32xf32>
    %195 = math.exp %194 : vector<8x32xf32>
    %cst_61 = arith.constant 1.000000e+00 : f32
    %196 = vector.broadcast %cst_61 : f32 to vector<8x32xf32>
    %197 = arith.addf %196, %195 : vector<8x32xf32>
    %198 = arith.divf %196, %197 : vector<8x32xf32>
    %199 = vector.extract_strided_slice %186 {offsets = [0, 64], sizes = [8, 32], strides = [1, 1]} : vector<8x128xf32> to vector<8x32xf32>
    %200 = math.tanh %199 : vector<8x32xf32>
    %201 = vector.extract_strided_slice %186 {offsets = [0, 96], sizes = [8, 32], strides = [1, 1]} : vector<8x128xf32> to vector<8x32xf32>
    %202 = arith.negf %201 : vector<8x32xf32>
    %203 = math.exp %202 : vector<8x32xf32>
    %cst_62 = arith.constant 1.000000e+00 : f32
    %204 = vector.broadcast %cst_62 : f32 to vector<8x32xf32>
    %205 = arith.addf %204, %203 : vector<8x32xf32>
    %206 = arith.divf %204, %205 : vector<8x32xf32>
    %207 = arith.mulf %198, %167 : vector<8x32xf32>
    %208 = arith.mulf %192, %200 : vector<8x32xf32>
    %209 = arith.addf %207, %208 : vector<8x32xf32>
    %210 = math.tanh %209 : vector<8x32xf32>
    %211 = arith.mulf %206, %210 : vector<8x32xf32>
    %212 = arith.truncf %211 : vector<8x32xf32> to vector<8x32xbf16>
    %c0_63 = arith.constant 0 : index
    %213 = arith.index_cast %179 : i32 to index
    %c0_64 = arith.constant 0 : index
    %c0_65 = arith.constant 0 : index
    %214 = vector.load %arg4[%c0_63, %213, %c0_64, %c0_65] : memref<1x8x8x32xbf16, #tpu.memory_space<vmem>>, vector<1x1x8x32xbf16>
    %215 = vector.shape_cast %214 : vector<1x1x8x32xbf16> to vector<8x32xbf16>
    %216 = vector.shape_cast %212 : vector<8x32xbf16> to vector<1x1x8x32xbf16>
    tpu.vector_store %arg4[%c0_63, %213, %c0_64, %c0_65], %216 {strides = array<i32>} : memref<1x8x8x32xbf16, #tpu.memory_space<vmem>>, vector<1x1x8x32xbf16>,
    %c5_i32 = arith.constant 5 : i32
    %c2_i32_66 = arith.constant 2 : i32
    %217 = arith.muli %c2_i32_66, %arg0 : i32
    %c1_i32_67 = arith.constant 1 : i32
    %218 = arith.subi %c1_i32_67, %217 : i32
    %219 = arith.muli %c5_i32, %218 : i32
    %c7_i32_68 = arith.constant 7 : i32
    %220 = arith.muli %arg0, %c7_i32_68 : i32
    %221 = arith.addi %219, %220 : i32
    %222 = arith.index_cast %221 : i32 to index
    %c0_69 = arith.constant 0 : index
    %c0_70 = arith.constant 0 : index
    %223 = vector.load %arg2[%222, %c0_69, %c0_70] : memref<8x8x128xbf16, #tpu.memory_space<vmem>>, vector<1x8x128xbf16>
    %224 = vector.shape_cast %223 : vector<1x8x128xbf16> to vector<8x128xbf16>
    %225 = arith.extf %224 : vector<8x128xbf16> to vector<8x128xf32>
    %226 = arith.truncf %211 : vector<8x32xf32> to vector<8x32xbf16>
    %cst_71 = arith.constant dense<0.000000e+00> : vector<8x128xf32>
    %227 = tpu.matmul %226, %4, %cst_71 {dimension_numbers = #tpu.dot_dimension_numbers<[1], [0], [0], [1], [0, 0, 1, 1], [], []>} : vector<8x32xbf16>, vector<32x128xbf16>, vector<8x128xf32> -> vector<8x128xf32>
    %228 = arith.addf %225, %227 : vector<8x128xf32>
    %229 = vector.extract_strided_slice %228 {offsets = [0, 0], sizes = [8, 32], strides = [1, 1]} : vector<8x128xf32> to vector<8x32xf32>
    %230 = arith.negf %229 : vector<8x32xf32>
    %231 = math.exp %230 : vector<8x32xf32>
    %cst_72 = arith.constant 1.000000e+00 : f32
    %232 = vector.broadcast %cst_72 : f32 to vector<8x32xf32>
    %233 = arith.addf %232, %231 : vector<8x32xf32>
    %234 = arith.divf %232, %233 : vector<8x32xf32>
    %235 = vector.extract_strided_slice %228 {offsets = [0, 32], sizes = [8, 32], strides = [1, 1]} : vector<8x128xf32> to vector<8x32xf32>
    %236 = arith.negf %235 : vector<8x32xf32>
    %237 = math.exp %236 : vector<8x32xf32>
    %cst_73 = arith.constant 1.000000e+00 : f32
    %238 = vector.broadcast %cst_73 : f32 to vector<8x32xf32>
    %239 = arith.addf %238, %237 : vector<8x32xf32>
    %240 = arith.divf %238, %239 : vector<8x32xf32>
    %241 = vector.extract_strided_slice %228 {offsets = [0, 64], sizes = [8, 32], strides = [1, 1]} : vector<8x128xf32> to vector<8x32xf32>
    %242 = math.tanh %241 : vector<8x32xf32>
    %243 = vector.extract_strided_slice %228 {offsets = [0, 96], sizes = [8, 32], strides = [1, 1]} : vector<8x128xf32> to vector<8x32xf32>
    %244 = arith.negf %243 : vector<8x32xf32>
    %245 = math.exp %244 : vector<8x32xf32>
    %cst_74 = arith.constant 1.000000e+00 : f32
    %246 = vector.broadcast %cst_74 : f32 to vector<8x32xf32>
    %247 = arith.addf %246, %245 : vector<8x32xf32>
    %248 = arith.divf %246, %247 : vector<8x32xf32>
    %249 = arith.mulf %240, %209 : vector<8x32xf32>
    %250 = arith.mulf %234, %242 : vector<8x32xf32>
    %251 = arith.addf %249, %250 : vector<8x32xf32>
    %252 = math.tanh %251 : vector<8x32xf32>
    %253 = arith.mulf %248, %252 : vector<8x32xf32>
    %254 = arith.truncf %253 : vector<8x32xf32> to vector<8x32xbf16>
    %c0_75 = arith.constant 0 : index
    %255 = arith.index_cast %221 : i32 to index
    %c0_76 = arith.constant 0 : index
    %c0_77 = arith.constant 0 : index
    %256 = vector.load %arg4[%c0_75, %255, %c0_76, %c0_77] : memref<1x8x8x32xbf16, #tpu.memory_space<vmem>>, vector<1x1x8x32xbf16>
    %257 = vector.shape_cast %256 : vector<1x1x8x32xbf16> to vector<8x32xbf16>
    %258 = vector.shape_cast %254 : vector<8x32xbf16> to vector<1x1x8x32xbf16>
    tpu.vector_store %arg4[%c0_75, %255, %c0_76, %c0_77], %258 {strides = array<i32>} : memref<1x8x8x32xbf16, #tpu.memory_space<vmem>>, vector<1x1x8x32xbf16>,
    %c6_i32 = arith.constant 6 : i32
    %c2_i32_78 = arith.constant 2 : i32
    %259 = arith.muli %c2_i32_78, %arg0 : i32
    %c1_i32_79 = arith.constant 1 : i32
    %260 = arith.subi %c1_i32_79, %259 : i32
    %261 = arith.muli %c6_i32, %260 : i32
    %c7_i32_80 = arith.constant 7 : i32
    %262 = arith.muli %arg0, %c7_i32_80 : i32
    %263 = arith.addi %261, %262 : i32
    %264 = arith.index_cast %263 : i32 to index
    %c0_81 = arith.constant 0 : index
    %c0_82 = arith.constant 0 : index
    %265 = vector.load %arg2[%264, %c0_81, %c0_82] : memref<8x8x128xbf16, #tpu.memory_space<vmem>>, vector<1x8x128xbf16>
    %266 = vector.shape_cast %265 : vector<1x8x128xbf16> to vector<8x128xbf16>
    %267 = arith.extf %266 : vector<8x128xbf16> to vector<8x128xf32>
    %268 = arith.truncf %253 : vector<8x32xf32> to vector<8x32xbf16>
    %cst_83 = arith.constant dense<0.000000e+00> : vector<8x128xf32>
    %269 = tpu.matmul %268, %4, %cst_83 {dimension_numbers = #tpu.dot_dimension_numbers<[1], [0], [0], [1], [0, 0, 1, 1], [], []>} : vector<8x32xbf16>, vector<32x128xbf16>, vector<8x128xf32> -> vector<8x128xf32>
    %270 = arith.addf %267, %269 : vector<8x128xf32>
    %271 = vector.extract_strided_slice %270 {offsets = [0, 0], sizes = [8, 32], strides = [1, 1]} : vector<8x128xf32> to vector<8x32xf32>
    %272 = arith.negf %271 : vector<8x32xf32>
    %273 = math.exp %272 : vector<8x32xf32>
    %cst_84 = arith.constant 1.000000e+00 : f32
    %274 = vector.broadcast %cst_84 : f32 to vector<8x32xf32>
    %275 = arith.addf %274, %273 : vector<8x32xf32>
    %276 = arith.divf %274, %275 : vector<8x32xf32>
    %277 = vector.extract_strided_slice %270 {offsets = [0, 32], sizes = [8, 32], strides = [1, 1]} : vector<8x128xf32> to vector<8x32xf32>
    %278 = arith.negf %277 : vector<8x32xf32>
    %279 = math.exp %278 : vector<8x32xf32>
    %cst_85 = arith.constant 1.000000e+00 : f32
    %280 = vector.broadcast %cst_85 : f32 to vector<8x32xf32>
    %281 = arith.addf %280, %279 : vector<8x32xf32>
    %282 = arith.divf %280, %281 : vector<8x32xf32>
    %283 = vector.extract_strided_slice %270 {offsets = [0, 64], sizes = [8, 32], strides = [1, 1]} : vector<8x128xf32> to vector<8x32xf32>
    %284 = math.tanh %283 : vector<8x32xf32>
    %285 = vector.extract_strided_slice %270 {offsets = [0, 96], sizes = [8, 32], strides = [1, 1]} : vector<8x128xf32> to vector<8x32xf32>
    %286 = arith.negf %285 : vector<8x32xf32>
    %287 = math.exp %286 : vector<8x32xf32>
    %cst_86 = arith.constant 1.000000e+00 : f32
    %288 = vector.broadcast %cst_86 : f32 to vector<8x32xf32>
    %289 = arith.addf %288, %287 : vector<8x32xf32>
    %290 = arith.divf %288, %289 : vector<8x32xf32>
    %291 = arith.mulf %282, %251 : vector<8x32xf32>
    %292 = arith.mulf %276, %284 : vector<8x32xf32>
    %293 = arith.addf %291, %292 : vector<8x32xf32>
    %294 = math.tanh %293 : vector<8x32xf32>
    %295 = arith.mulf %290, %294 : vector<8x32xf32>
    %296 = arith.truncf %295 : vector<8x32xf32> to vector<8x32xbf16>
    %c0_87 = arith.constant 0 : index
    %297 = arith.index_cast %263 : i32 to index
    %c0_88 = arith.constant 0 : index
    %c0_89 = arith.constant 0 : index
    %298 = vector.load %arg4[%c0_87, %297, %c0_88, %c0_89] : memref<1x8x8x32xbf16, #tpu.memory_space<vmem>>, vector<1x1x8x32xbf16>
    %299 = vector.shape_cast %298 : vector<1x1x8x32xbf16> to vector<8x32xbf16>
    %300 = vector.shape_cast %296 : vector<8x32xbf16> to vector<1x1x8x32xbf16>
    tpu.vector_store %arg4[%c0_87, %297, %c0_88, %c0_89], %300 {strides = array<i32>} : memref<1x8x8x32xbf16, #tpu.memory_space<vmem>>, vector<1x1x8x32xbf16>,
    %c7_i32_90 = arith.constant 7 : i32
    %c2_i32_91 = arith.constant 2 : i32
    %301 = arith.muli %c2_i32_91, %arg0 : i32
    %c1_i32_92 = arith.constant 1 : i32
    %302 = arith.subi %c1_i32_92, %301 : i32
    %303 = arith.muli %c7_i32_90, %302 : i32
    %c7_i32_93 = arith.constant 7 : i32
    %304 = arith.muli %arg0, %c7_i32_93 : i32
    %305 = arith.addi %303, %304 : i32
    %306 = arith.index_cast %305 : i32 to index
    %c0_94 = arith.constant 0 : index
    %c0_95 = arith.constant 0 : index
    %307 = vector.load %arg2[%306, %c0_94, %c0_95] : memref<8x8x128xbf16, #tpu.memory_space<vmem>>, vector<1x8x128xbf16>
    %308 = vector.shape_cast %307 : vector<1x8x128xbf16> to vector<8x128xbf16>
    %309 = arith.extf %308 : vector<8x128xbf16> to vector<8x128xf32>
    %310 = arith.truncf %295 : vector<8x32xf32> to vector<8x32xbf16>
    %cst_96 = arith.constant dense<0.000000e+00> : vector<8x128xf32>
    %311 = tpu.matmul %310, %4, %cst_96 {dimension_numbers = #tpu.dot_dimension_numbers<[1], [0], [0], [1], [0, 0, 1, 1], [], []>} : vector<8x32xbf16>, vector<32x128xbf16>, vector<8x128xf32> -> vector<8x128xf32>
    %312 = arith.addf %309, %311 : vector<8x128xf32>
    %313 = vector.extract_strided_slice %312 {offsets = [0, 0], sizes = [8, 32], strides = [1, 1]} : vector<8x128xf32> to vector<8x32xf32>
    %314 = arith.negf %313 : vector<8x32xf32>
    %315 = math.exp %314 : vector<8x32xf32>
    %cst_97 = arith.constant 1.000000e+00 : f32
    %316 = vector.broadcast %cst_97 : f32 to vector<8x32xf32>
    %317 = arith.addf %316, %315 : vector<8x32xf32>
    %318 = arith.divf %316, %317 : vector<8x32xf32>
    %319 = vector.extract_strided_slice %312 {offsets = [0, 32], sizes = [8, 32], strides = [1, 1]} : vector<8x128xf32> to vector<8x32xf32>
    %320 = arith.negf %319 : vector<8x32xf32>
    %321 = math.exp %320 : vector<8x32xf32>
    %cst_98 = arith.constant 1.000000e+00 : f32
    %322 = vector.broadcast %cst_98 : f32 to vector<8x32xf32>
    %323 = arith.addf %322, %321 : vector<8x32xf32>
    %324 = arith.divf %322, %323 : vector<8x32xf32>
    %325 = vector.extract_strided_slice %312 {offsets = [0, 64], sizes = [8, 32], strides = [1, 1]} : vector<8x128xf32> to vector<8x32xf32>
    %326 = math.tanh %325 : vector<8x32xf32>
    %327 = vector.extract_strided_slice %312 {offsets = [0, 96], sizes = [8, 32], strides = [1, 1]} : vector<8x128xf32> to vector<8x32xf32>
    %328 = arith.negf %327 : vector<8x32xf32>
    %329 = math.exp %328 : vector<8x32xf32>
    %cst_99 = arith.constant 1.000000e+00 : f32
    %330 = vector.broadcast %cst_99 : f32 to vector<8x32xf32>
    %331 = arith.addf %330, %329 : vector<8x32xf32>
    %332 = arith.divf %330, %331 : vector<8x32xf32>
    %333 = arith.mulf %324, %293 : vector<8x32xf32>
    %334 = arith.mulf %318, %326 : vector<8x32xf32>
    %335 = arith.addf %333, %334 : vector<8x32xf32>
    %336 = math.tanh %335 : vector<8x32xf32>
    %337 = arith.mulf %332, %336 : vector<8x32xf32>
    %338 = arith.truncf %337 : vector<8x32xf32> to vector<8x32xbf16>
    %c0_100 = arith.constant 0 : index
    %339 = arith.index_cast %305 : i32 to index
    %c0_101 = arith.constant 0 : index
    %c0_102 = arith.constant 0 : index
    %340 = vector.load %arg4[%c0_100, %339, %c0_101, %c0_102] : memref<1x8x8x32xbf16, #tpu.memory_space<vmem>>, vector<1x1x8x32xbf16>
    %341 = vector.shape_cast %340 : vector<1x1x8x32xbf16> to vector<8x32xbf16>
    %342 = vector.shape_cast %338 : vector<8x32xbf16> to vector<1x1x8x32xbf16>
    tpu.vector_store %arg4[%c0_100, %339, %c0_101, %c0_102], %342 {strides = array<i32>} : memref<1x8x8x32xbf16, #tpu.memory_space<vmem>>, vector<1x1x8x32xbf16>,
    %c8_i32 = arith.constant 8 : i32
    %c0_103 = arith.constant 0 : index
    %c0_104 = arith.constant 0 : index
    %343 = vector.load %arg5[%c0_103, %c0_104] : memref<8x32xf32, #tpu.memory_space<vmem>>, vector<8x32xf32>
    tpu.vector_store %arg5[%c0_103, %c0_104], %337 {strides = array<i32>} : memref<8x32xf32, #tpu.memory_space<vmem>>, vector<8x32xf32>,
    %c0_105 = arith.constant 0 : index
    %c0_106 = arith.constant 0 : index
    %344 = vector.load %arg6[%c0_105, %c0_106] : memref<8x32xf32, #tpu.memory_space<vmem>>, vector<8x32xf32>
    tpu.vector_store %arg6[%c0_105, %c0_106], %335 {strides = array<i32>} : memref<8x32xf32, #tpu.memory_space<vmem>>, vector<8x32xf32>,
    return
  }
  func.func @transform_0(%arg0: i32, %arg1: i32) -> (i32, i32, i32) {
    %c2_i32 = arith.constant 2 : i32
    %0 = arith.muli %c2_i32, %arg0 : i32
    %c1_i32 = arith.constant 1 : i32
    %1 = arith.subi %c1_i32, %0 : i32
    %2 = arith.muli %arg1, %1 : i32
    %c0_i32 = arith.constant 0 : i32
    %3 = arith.muli %arg0, %c0_i32 : i32
    %4 = arith.addi %2, %3 : i32
    %c0_i32_0 = arith.constant 0 : i32
    %c0_i32_1 = arith.constant 0 : i32
    return %4, %c0_i32_0, %arg0 : i32, i32, i32
  }
  func.func @transform_1(%arg0: i32, %arg1: i32) -> (i32, i32, i32) {
    %c0_i32 = arith.constant 0 : i32
    %c0_i32_0 = arith.constant 0 : i32
    %c0_i32_1 = arith.constant 0 : i32
    return %arg0, %c0_i32, %c0_i32_0 : i32, i32, i32
  }
  func.func @transform_2(%arg0: i32, %arg1: i32) -> (i32, i32, i32, i32) {
    %c2_i32 = arith.constant 2 : i32
    %0 = arith.muli %c2_i32, %arg0 : i32
    %c1_i32 = arith.constant 1 : i32
    %1 = arith.subi %c1_i32, %0 : i32
    %2 = arith.muli %arg1, %1 : i32
    %c0_i32 = arith.constant 0 : i32
    %3 = arith.muli %arg0, %c0_i32 : i32
    %4 = arith.addi %2, %3 : i32
    %c0_i32_0 = arith.constant 0 : i32
    %c0_i32_1 = arith.constant 0 : i32
    %c0_i32_2 = arith.constant 0 : i32
    return %arg0, %4, %c0_i32_0, %c0_i32_1 : i32, i32, i32, i32
  }
}

</mosaic_0001>

<bundles_post_ra>
// kernel: ner_model_forward.2
= control target key start
LH: loop header
LB: loop body
LE: loop exit
PB: predicated region body
PF: predicated region fallthrough
CT: control target
= control target key end

     0   :  { %s1324_s9 = smov 0   ;;  %s1326_s10 = smov 0   ;;  %s1573_s0 = inlined_call_operand.vmem [shape: bf16[8,8,256], index: 0, kind: input, shape index: {}]   ;;  %s1574_s1 = inlined_call_operand.vmem [shape: bf16[2,32,128], index: 1, kind: input, shape index: {}]   ;;  %s1575_s2 = inlined_call_operand.vmem [shape: bf16[2,8,8,32], index: 2, kind: output, shape index: {}]  }
   0x1   :  { %s1328_s11 = smov 0   ;;  %s1330_s12 = smov 0  }
   0x2   :  { %s1332_s13 = smov 0  }
   0x3 LB: > { %s24_s14 = sadd.s32 1, %s1299_s12  ;;  %p46_p1 = scmp.ne.s32.totalorder %s1291_s10, %s1287_s9  ;;  %s1303_s13 = sphi %s1332_s13, %s12_s13   ;;  %s1299_s12 = sphi %s1330_s12, %s1579_s12   ;;  %s1295_s11 = sphi %s1328_s11, %s1578_s11   ;;  %s1291_s10 = sphi %s1326_s10, %s1577_s10   ;;  %s1287_s9 = sphi %s1324_s9, %s1576_s9  }
   0x4   : > { %p26_p0 = scmp.ge.s32.totalorder %s24_s14, 2  ;;  %p47_p2 = scmp.eq.s32.totalorder %s1303_s13, 0 }
   0x5   : > { %s39_s16 = sadd.s32 1, %s1291_s10  ;;  %p1095_p5 = scmp.ge.s32.totalorder %s1303_s13, 2 }
   0x6   : > { %s1581_s14 = smov (%p26_p0, %s24_s14), 0  ;;  %p48_p3 = por %p47_p2, %p46_p1 }
   0x7   : > { %s35_s15 = ssub.s32 %s1299_s12, %s1581_s14  ;;  %132 = sbr.rel (%p1095_p5) target bundleno = 24 (0x18), region = 16 }
   0x8   : > { %p37_p4 = scmp.eq.s32.totalorder %s35_s15, 0 }
   0xa   : > { %s1359_s17 = scalar_select %p37_p4, %s1291_s10, %s39_s16  }
   0xc   : > { %135 = sbr.rel (!%p48_p3) target bundleno = 24 (0x18), region = 20  ;;  %s137_s18 = sand.u32 (%p48_p3), 1, %s1291_s10  }
   0xd   : > { %s1098_s19 = sshll.u32 (%p48_p3), %s1299_s12, 2  ;;  %s1096_s20 = sshll.u32 (%p48_p3), %s137_s18, 5 }
   0xe   : > { %s147_s23 = scalar_lea.vmem (%p48_p3), %s1573_s0, %s1098_s19  ;;  %s139_s24 = scalar_lea.vmem (%p48_p3), [#allocation4], %s1096_s20 }
   0xf   : > { %v164_v0 = vld [vmem:[%s147_s23] sm:$0xf] (%p48_p3)  ;;  %v166_v1 = vld [vmem:[%s147_s23 + $0x8] sm:$0xf] (%p48_p3)  ;;  %v168_v2 = vld [vmem:[%s147_s23 + $0x10] sm:$0xf] (%p48_p3) }
  0x10   : > { %165 = vst [vmem:[%s139_s24] sm:$0xf] (%p48_p3), %v164_v0  ;;  %v170_v3 = vld [vmem:[%s147_s23 + $0x18] sm:$0xf] (%p48_p3)  ;;  %v172_v4 = vld [vmem:[%s147_s23 + $0x20] sm:$0xf] (%p48_p3) }
  0x11   : > { %167 = vst [vmem:[%s139_s24 + $0x4] sm:$0xf] %v166_v1  ;;  %v174_v5 = vld [vmem:[%s147_s23 + $0x28] sm:$0xf]  ;;  %v176_v6 = vld [vmem:[%s147_s23 + $0x30] sm:$0xf] }
  0x12   : > { %169 = vst [vmem:[%s139_s24 + $0x8] sm:$0xf] %v168_v2  ;;  %v178_v7 = vld [vmem:[%s147_s23 + $0x38] sm:$0xf] }
  0x13   : > { %171 = vst [vmem:[%s139_s24 + $0xc] sm:$0xf] %v170_v3 }
  0x14   : > { %173 = vst [vmem:[%s139_s24 + $0x10] sm:$0xf] %v172_v4 }
  0x15   : > { %175 = vst [vmem:[%s139_s24 + $0x14] sm:$0xf] %v174_v5 }
  0x16   : > { %177 = vst [vmem:[%s139_s24 + $0x18] sm:$0xf] %v176_v6 }
  0x17   : > { %179 = vst [vmem:[%s139_s24 + $0x1c] sm:$0xf] %v178_v7 }
  0x18 PF: > { %p1099_p6 = scmp.ge.s32.totalorder %s1303_s13, 1  ;;  %p226_p7 = scmp.lt.s32.totalorder %s1303_s13, 3 }
  0x1a   : > { %p227_p8 = pnand %p1099_p6, %p226_p7 }
  0x1b   : > { %p270_p9 = scmp.lt.s32.totalorder (!%p227_p8), %s1295_s11, 1  ;;  %s233_s30 = sand.u32 (!%p227_p8), 1, %s1287_s9  }
  0x1c   : > { %230 = sbr.rel (%p227_p8) target bundleno = 4738 (0x1282), region = 65  ;;  %s1100_s3 = sshll.u32 (!%p227_p8), %s233_s30, 5 }
  0x1d   : > { %s1155_s4 = smul.u32 (!%p227_p8), 28, %s1295_s11  ;;  %s1382_s5 = scalar_lea.vmem (!%p227_p8), [#allocation4], %s1100_s3 }
  0x1e   : > { %s1306_s7 = smov (!%p227_p8), 64   ;;  %s1307_s8 = smov (!%p227_p8), 32  }
  0x1f   : > { %s307_s6 = scalar_lea.vmem (!%p227_p8), %s1382_s5, %s1155_s4 [#allocation4]  ;;  %s1118_s9 = sshll.u32 (!%p227_p8), %s1295_s11, 1 }
  0x20   : > { %s1398_s15 = smul.u32 (!%p227_p8), 7, %s1295_s11  ;;  %s1400_s16 = ssub.s32 (!%p227_p8), 1, %s1118_s9 }
  0x21   : > { %vm296_vm0 = vcmask 261120   ;;  %v1305_v8 = vmov 0.0   ;;  %s1372_s25 = scalar_select %p270_p9, %s1295_s11, 1  ;;  %v308_v13 = vld [vmem:[%s307_s6] sm:$0xf] }
  0x22   : > { %297 = vst.msk [vmem:[#allocation2] sm:$0xff] %vm296_vm0, %v1305_v8  ;;  %v309_v14 = vunpack.c.l.bf16 %v308_v13  ;;  %s393_s18 = sadd.s32 %s1400_s16, %s1398_s15  ;;  %s1123_s21 = sshll.u32 %s1400_s16, 1 }
  0x23   : > { %298 = vst.msk [vmem:[#allocation3] sm:$0xff] %vm296_vm0, %v1305_v8  ;;  %s1151_s26 = sshll.u32 %s1372_s25, 4  ;;  %s1404_s19 = sshll.u32 %s393_s18, 2 }
  0x24   : > { %s274_s29 = scalar_lea.vmem %s1574_s1, %s1151_s26  ;;  %s395_s20 = scalar_lea.vmem %s1382_s5, %s1404_s19 [#allocation4] }
  0x25   : > { %v1154_v9 = vld [vmem:[%s274_s29 + $0x8] sm:$0xff]  ;;  %v1153_v10 = vld [vmem:[%s274_s29] sm:$0xff]  ;;  %s1418_s22 = sadd.s32 %s1123_s21, %s1398_s15  ;;  %s536_s26 = smul.u32 3, %s1400_s16 }
  0x26   : > { %333 = vmatpush.bf16.msra.mxu0 %v1154_v9  ;;  %411 = vmatpush.bf16.msra.mxu1 %v1154_v9  ;;  %v396_v46 = vld [vmem:[%s395_s20] sm:$0xf]  ;;  %s1124_s23 = sshll.u32 %s1418_s22, 2  ;;  %s1132_s30 = sshll.u32 %s1400_s16, 2 }
  0x27   : > { %483 = vmatpush.bf16.msra.mxu2 %v1154_v9  ;;  %555 = vmatpush.bf16.msra.mxu3 %v1154_v9  ;;  %v397_v47 = vunpack.c.l.bf16 %v396_v46  ;;  %s467_s24 = scalar_lea.vmem %s1382_s5, %s1124_s23 [#allocation4]  ;;  %s1434_s27 = sadd.s32 %s536_s26, %s1398_s15 }
  0x28   : > { %v468_v13 = vld [vmem:[%s467_s24] sm:$0xf]  ;;  %s1128_s28 = sshll.u32 %s1434_s27, 2  ;;  %s1450_s3 = sadd.s32 %s1132_s30, %s1398_s15 }
  0x29   : > { %v303_v11 = vld [vmem:[#allocation2] sm:$0xff]  ;;  %s539_s29 = scalar_lea.vmem %s1382_s5, %s1128_s28 [#allocation4]  ;;  %s1133_s6 = sshll.u32 %s1450_s3, 2 }
  0x2a   : > { %v310_v12 = vpack.c.bf16 %v303_v11, %v303_v11  ;;  %334 = vmatpush.bf16.msra.mxu0 %v1153_v10  ;;  %412 = vmatpush.bf16.msra.mxu1 %v1153_v10  ;;  %v304_v19 = vld [vmem:[#allocation3] sm:$0xff]  ;;  %s611_s9 = scalar_lea.vmem %s1382_s5, %s1133_s6 [#allocation4]  ;;  %s680_s18 = smul.u32 5, %s1400_s16 }
  0x2b   : > { %484 = vmatpush.bf16.msra.mxu2 %v1153_v10  ;;  %556 = vmatpush.bf16.msra.mxu3 %v1153_v10  ;;  %s752_s26 = smul.u32 6, %s1400_s16 }
  0x2c   : > { %s1466_s20 = sadd.s32 %s680_s18, %s1398_s15  ;;  %s824_s18 = smul.u32 7, %s1400_s16 }
  0x2d   : > { %1115 = vmatmul.msk.bf16.vlgmr.msra.gmra.mxu0 %vm296_vm0, %v310_v12  ;;  %s1137_s21 = sshll.u32 %s1466_s20, 2 }
  0x2e   : > { %627 = vmatpush.bf16.msrb.mxu0 %v1154_v9  ;;  %699 = vmatpush.bf16.msrb.mxu1 %v1154_v9  ;;  %s683_s24 = scalar_lea.vmem %s1382_s5, %s1137_s21 [#allocation4] }
  0x2f   : > { %771 = vmatpush.bf16.msrb.mxu2 %v1154_v9  ;;  %843 = vmatpush.bf16.msrb.mxu3 %v1154_v9 }
  0x32   : > { %628 = vmatpush.bf16.msrb.mxu0 %v1153_v10  ;;  %700 = vmatpush.bf16.msrb.mxu1 %v1153_v10 }
  0x33   : > { %772 = vmatpush.bf16.msrb.mxu2 %v1153_v10  ;;  %844 = vmatpush.bf16.msrb.mxu3 %v1153_v10 }
  0xaa   : > { %v336_v15 = vpop.f32.mrf.mxu0 }
  0xab   : > { %v340_v16 = vadd.f32 %v336_v15, %v309_v14  ;;  %v469_v14 = vunpack.c.l.bf16 %v468_v13  ;;  %v612_v13 = vld [vmem:[%s611_s9] sm:$0xf] }
  0xad   : > { %1201 = vtanh.f32 %v340_v16  ;;  %v1116_v20 = vmul.f32 -1.442695, %v340_v16 }
  0xaf   : > { %1203 = vpow2.f32 %v1116_v20 }
  0xb2   : > { %v338_v17 = vpop.f32.mrf.mxu0 }
  0xb3   : > { %v1202_v18 = vpop.eup %1201 }
  0xb4   : > { %367 = vrot.lane.b32.xlu0 %v1202_v18, %s1306_s7 }
  0xb5   : > { %v1204_v21 = vpop.eup %1203 }
  0xb6   : > { %v344_v22 = vadd.f32 1.0, %v1204_v21 }
  0xb8   : > { %1205 = vrcp.f32 %v344_v22  ;;  %v356_v28 = vand.u32 2147483648, %v344_v22  ;;  %vm350_vm2 = vweird.f32 %v344_v22  ;;  %v354_v29 = vand.u32 2147483647, %v344_v22 }
  0xba   : > { %v357_v31 = vor.u32 1.1754944e-38, %v356_v28  ;;  %vm355_vm4 = vcmp.eq.f32.partialorder %v354_v29, 8.507059e+37 }
  0xbc   : > { %362 = vrot.lane.b32.xlu0 %v304_v19, %s1307_s8 }
  0xbe   : > { %v1206_v23 = vpop.eup %1205 }
  0xbf   : > { %v346_v24 = vmul.f32 %v1206_v23, %v344_v22  ;;  %vm351_vm1 = vweird.f32 %v1206_v23 }
  0xc0   : > { %vm352_vm3 = vmor %vm350_vm2, %vm351_vm1 }
  0xc1   : > { %v347_v25 = vsub.f32 1.0, %v346_v24 }
  0xc3   : > { %v348_v26 = vmul.f32 %v1206_v23, %v347_v25 }
  0xc5   : > { %v349_v27 = vadd.f32 %v1206_v23, %v348_v26 }
  0xc7   : > { %v353_v30 = vsel %vm352_vm3, %v1206_v23, %v349_v27 }
  0xc8   : > { %v358_v33 = vsel %vm355_vm4, %v357_v31, %v353_v30 }
 0x126   : > { %v368_v32 = vpop.permute.xlu0 %367 }
 0x127   : > { %v370_v34 = vmul.f32 %v368_v32, %v358_v33 }
 0x129   : > { %372 = vrot.lane.b32.xlu1 %v370_v34, %s1307_s8 }
 0x12e   : > { %v363_v35 = vpop.permute.xlu0 %362 }
 0x12f   : > { %v365_v36 = vmul.f32 %v363_v35, %v358_v33 }
 0x19b   : > { %v373_v37 = vpop.permute.xlu1 %372 }
 0x19c   : > { %v375_v38 = vadd.f32 %v373_v37, %v365_v36 }
 0x19e   : > { %1207 = vtanh.f32 %v375_v38 }
 0x1a4   : > { %v1208_v39 = vpop.eup %1207 }
 0x1a5   : > { %378 = vrot.lane.b32.xlu1 %v1208_v39, %s1306_s7 }
 0x217   : > { %v379_v40 = vpop.permute.xlu1 %378 }
 0x218   : > { %v381_v41 = vmul.f32 %v379_v40, %v358_v33 }
 0x21a   : > { %v1391_v42 = vpack.c.bf16 %v381_v41, %v381_v41 }
 0x21c   : > { %v398_v43 = vunpack.c.l.b16 %v1391_v42 }
 0x21e   : > { %v399_v44 = vpack.c.b16 %v398_v43, %v398_v43 }
 0x220   : > { %400 = vrot.lane.b32.xlu2 %v399_v44, %s1307_s8 }
 0x27a   : > { %v401_v45 = vpop.permute.xlu2 %400 }
 0x27b   : > { %1120 = vmatmul.msk.bf16.vlgmr.msra.gmra.mxu1 %vm296_vm0, %v401_v45  ;;  %v540_v45 = vld [vmem:[%s539_s29] sm:$0xf]  ;;  %s1482_s29 = sadd.s32 %s752_s26, %s1398_s15 }
 0x27c   : > { %v541_v46 = vunpack.c.l.bf16 %v540_v45  ;;  %s1141_s30 = sshll.u32 %s1482_s29, 2 }
 0x27d   : > { %s755_s9 = scalar_lea.vmem %s1382_s5, %s1141_s30 [#allocation4] }
 0x2f8   : > { %v414_v48 = vpop.f32.mrf.mxu1 }
 0x2f9   : > { %v418_v49 = vadd.f32 %v414_v48, %v397_v47 }
 0x2fb   : > { %1209 = vtanh.f32 %v418_v49  ;;  %v1121_v52 = vmul.f32 -1.442695, %v418_v49 }
 0x2fd   : > { %1211 = vpow2.f32 %v1121_v52 }
 0x300   : > { %v416_v50 = vpop.f32.mrf.mxu1 }
 0x301   : > { %v1210_v51 = vpop.eup %1209 }
 0x302   : > { %441 = vrot.lane.b32.xlu2 %v1210_v51, %s1306_s7 }
 0x303   : > { %v1212_v53 = vpop.eup %1211 }
 0x304   : > { %v422_v54 = vadd.f32 1.0, %v1212_v53 }
 0x306   : > { %1213 = vrcp.f32 %v422_v54  ;;  %v434_v60 = vand.u32 2147483648, %v422_v54  ;;  %vm428_vm6 = vweird.f32 %v422_v54  ;;  %v432_v61 = vand.u32 2147483647, %v422_v54 }
 0x308   : > { %v435_v63 = vor.u32 1.1754944e-38, %v434_v60  ;;  %vm433_vm8 = vcmp.eq.f32.partialorder %v432_v61, 8.507059e+37 }
 0x30c   : > { %v1214_v55 = vpop.eup %1213 }
 0x30d   : > { %v424_v56 = vmul.f32 %v1214_v55, %v422_v54  ;;  %vm429_vm5 = vweird.f32 %v1214_v55 }
 0x30e   : > { %vm430_vm7 = vmor %vm428_vm6, %vm429_vm5 }
 0x30f   : > { %v425_v57 = vsub.f32 1.0, %v424_v56 }
 0x311   : > { %v426_v58 = vmul.f32 %v1214_v55, %v425_v57 }
 0x313   : > { %v427_v59 = vadd.f32 %v1214_v55, %v426_v58 }
 0x315   : > { %v431_v62 = vsel %vm430_vm7, %v1214_v55, %v427_v59 }
 0x316   : > { %v436_v1 = vsel %vm433_vm8, %v435_v63, %v431_v62 }
 0x317   : > { %v439_v3 = vmul.f32 %v436_v1, %v375_v38 }
 0x35c   : > { %v442_v0 = vpop.permute.xlu2 %441 }
 0x35d   : > { %v444_v2 = vmul.f32 %v442_v0, %v436_v1 }
 0x35f   : > { %446 = vrot.lane.b32.xlu0 %v444_v2, %s1307_s8 }
 0x3d1   : > { %v447_v4 = vpop.permute.xlu0 %446 }
 0x3d2   : > { %v449_v5 = vadd.f32 %v447_v4, %v439_v3 }
 0x3d4   : > { %1215 = vtanh.f32 %v449_v5 }
 0x3da   : > { %v1216_v6 = vpop.eup %1215 }
 0x3db   : > { %452 = vrot.lane.b32.xlu1 %v1216_v6, %s1306_s7 }
 0x44d   : > { %v453_v7 = vpop.permute.xlu1 %452 }
 0x44e   : > { %v455_v8 = vmul.f32 %v453_v7, %v436_v1 }
 0x450   : > { %v1411_v9 = vpack.c.bf16 %v455_v8, %v455_v8 }
 0x452   : > { %v470_v10 = vunpack.c.l.b16 %v1411_v9 }
 0x454   : > { %v471_v11 = vpack.c.b16 %v470_v10, %v470_v10 }
 0x456   : > { %472 = vrot.lane.b32.xlu2 %v471_v11, %s1307_s8 }
 0x4b0   : > { %v473_v12 = vpop.permute.xlu2 %472 }
 0x4b1   : > { %1125 = vmatmul.msk.bf16.vlgmr.msra.gmra.mxu2 %vm296_vm0, %v473_v12 }
 0x534   : > { %v486_v15 = vpop.f32.mrf.mxu2 }
 0x535   : > { %v490_v16 = vadd.f32 %v486_v15, %v469_v14  ;;  %v613_v14 = vunpack.c.l.bf16 %v612_v13 }
 0x537   : > { %1217 = vtanh.f32 %v490_v16  ;;  %v1126_v19 = vmul.f32 -1.442695, %v490_v16 }
 0x539   : > { %1219 = vpow2.f32 %v1126_v19 }
 0x53c   : > { %v488_v17 = vpop.f32.mrf.mxu2 }
 0x53d   : > { %v1218_v18 = vpop.eup %1217 }
 0x53e   : > { %513 = vrot.lane.b32.xlu0 %v1218_v18, %s1306_s7 }
 0x53f   : > { %v1220_v20 = vpop.eup %1219 }
 0x540   : > { %v494_v21 = vadd.f32 1.0, %v1220_v20 }
 0x542   : > { %1221 = vrcp.f32 %v494_v21  ;;  %v506_v27 = vand.u32 2147483648, %v494_v21  ;;  %vm500_vm10 = vweird.f32 %v494_v21  ;;  %v504_v28 = vand.u32 2147483647, %v494_v21 }
 0x544   : > { %v507_v30 = vor.u32 1.1754944e-38, %v506_v27  ;;  %vm505_vm12 = vcmp.eq.f32.partialorder %v504_v28, 8.507059e+37 }
 0x548   : > { %v1222_v22 = vpop.eup %1221 }
 0x549   : > { %v496_v23 = vmul.f32 %v1222_v22, %v494_v21  ;;  %vm501_vm9 = vweird.f32 %v1222_v22 }
 0x54a   : > { %vm502_vm11 = vmor %vm500_vm10, %vm501_vm9 }
 0x54b   : > { %v497_v24 = vsub.f32 1.0, %v496_v23 }
 0x54d   : > { %v498_v25 = vmul.f32 %v1222_v22, %v497_v24 }
 0x54f   : > { %v499_v26 = vadd.f32 %v1222_v22, %v498_v25 }
 0x551   : > { %v503_v29 = vsel %vm502_vm11, %v1222_v22, %v499_v26 }
 0x552   : > { %v508_v32 = vsel %vm505_vm12, %v507_v30, %v503_v29 }
 0x553   : > { %v511_v34 = vmul.f32 %v508_v32, %v449_v5 }
 0x5b0   : > { %v514_v31 = vpop.permute.xlu0 %513 }
 0x5b1   : > { %v516_v33 = vmul.f32 %v514_v31, %v508_v32 }
 0x5b3   : > { %518 = vrot.lane.b32.xlu1 %v516_v33, %s1307_s8 }
 0x625   : > { %v519_v35 = vpop.permute.xlu1 %518 }
 0x626   : > { %v521_v36 = vadd.f32 %v519_v35, %v511_v34 }
 0x628   : > { %1223 = vtanh.f32 %v521_v36 }
 0x62e   : > { %v1224_v37 = vpop.eup %1223 }
 0x62f   : > { %524 = vrot.lane.b32.xlu2 %v1224_v37, %s1306_s7 }
 0x689   : > { %v525_v38 = vpop.permute.xlu2 %524 }
 0x68a   : > { %v527_v39 = vmul.f32 %v525_v38, %v508_v32 }
 0x68c   : > { %v1427_v40 = vpack.c.bf16 %v527_v39, %v527_v39 }
 0x68e   : > { %v542_v41 = vunpack.c.l.b16 %v1427_v40 }
 0x690   : > { %v543_v43 = vpack.c.b16 %v542_v41, %v542_v41 }
 0x692   : > { %544 = vrot.lane.b32.xlu0 %v543_v43, %s1307_s8 }
 0x704   : > { %v545_v44 = vpop.permute.xlu0 %544 }
 0x705   : > { %1129 = vmatmul.msk.bf16.vlgmr.msra.gmra.mxu3 %vm296_vm0, %v545_v44 }
 0x788   : > { %v558_v47 = vpop.f32.mrf.mxu3 }
 0x789   : > { %v562_v48 = vadd.f32 %v558_v47, %v541_v46  ;;  %v684_v46 = vld [vmem:[%s683_s24] sm:$0xf]  ;;  %s1495_s24 = sadd.s32 %s824_s18, %s1398_s15 }
 0x78a   : > { %v685_v47 = vunpack.c.l.bf16 %v684_v46  ;;  %s1145_s26 = sshll.u32 %s1495_s24, 2 }
 0x78b   : > { %1225 = vtanh.f32 %v562_v48  ;;  %v1130_v51 = vmul.f32 -1.442695, %v562_v48 }
 0x78d   : > { %1227 = vpow2.f32 %v1130_v51 }
 0x790   : > { %v560_v49 = vpop.f32.mrf.mxu3 }
 0x791   : > { %v1226_v50 = vpop.eup %1225 }
 0x792   : > { %585 = vrot.lane.b32.xlu1 %v1226_v50, %s1306_s7 }
 0x793   : > { %v1228_v52 = vpop.eup %1227 }
 0x794   : > { %v566_v53 = vadd.f32 1.0, %v1228_v52 }
 0x796   : > { %1229 = vrcp.f32 %v566_v53  ;;  %v578_v59 = vand.u32 2147483648, %v566_v53  ;;  %vm572_vm14 = vweird.f32 %v566_v53  ;;  %v576_v60 = vand.u32 2147483647, %v566_v53 }
 0x798   : > { %v579_v62 = vor.u32 1.1754944e-38, %v578_v59  ;;  %vm577_vm1 = vcmp.eq.f32.partialorder %v576_v60, 8.507059e+37 }
 0x79c   : > { %v1230_v54 = vpop.eup %1229 }
 0x79d   : > { %v568_v55 = vmul.f32 %v1230_v54, %v566_v53  ;;  %vm573_vm13 = vweird.f32 %v1230_v54 }
 0x79e   : > { %vm574_vm15 = vmor %vm572_vm14, %vm573_vm13 }
 0x79f   : > { %v569_v56 = vsub.f32 1.0, %v568_v55 }
 0x7a1   : > { %v570_v57 = vmul.f32 %v1230_v54, %v569_v56 }
 0x7a3   : > { %v571_v58 = vadd.f32 %v1230_v54, %v570_v57 }
 0x7a5   : > { %v575_v61 = vsel %vm574_vm15, %v1230_v54, %v571_v58 }
 0x7a6   : > { %v580_v0 = vsel %vm577_vm1, %v579_v62, %v575_v61 }
 0x7a7   : > { %v583_v2 = vmul.f32 %v580_v0, %v521_v36 }
 0x804   : > { %v586_v63 = vpop.permute.xlu1 %585 }
 0x805   : > { %v588_v1 = vmul.f32 %v586_v63, %v580_v0 }
 0x807   : > { %590 = vrot.lane.b32.xlu2 %v588_v1, %s1307_s8 }
 0x861   : > { %v591_v3 = vpop.permute.xlu2 %590 }
 0x862   : > { %v593_v4 = vadd.f32 %v591_v3, %v583_v2 }
 0x864   : > { %1231 = vtanh.f32 %v593_v4 }
 0x86a   : > { %v1232_v5 = vpop.eup %1231 }
 0x86b   : > { %596 = vrot.lane.b32.xlu0 %v1232_v5, %s1306_s7 }
 0x8dd   : > { %v597_v6 = vpop.permute.xlu0 %596 }
 0x8de   : > { %v599_v7 = vmul.f32 %v597_v6, %v580_v0 }
 0x8e0   : > { %v1443_v8 = vpack.c.bf16 %v599_v7, %v599_v7 }
 0x8e2   : > { %v614_v10 = vunpack.c.l.b16 %v1443_v8 }
 0x8e4   : > { %v615_v11 = vpack.c.b16 %v614_v10, %v614_v10 }
 0x8e6   : > { %616 = vrot.lane.b32.xlu1 %v615_v11, %s1307_s8 }
 0x958   : > { %v617_v12 = vpop.permute.xlu1 %616 }
 0x959   : > { %1134 = vmatmul.msk.bf16.vlgmr.msrb.gmra.mxu0 %vm296_vm0, %v617_v12 }
 0x9d6   : > { %v630_v15 = vpop.f32.mrf.mxu0 }
 0x9d7   : > { %v634_v16 = vadd.f32 %v630_v15, %v613_v14  ;;  %v756_v15 = vld [vmem:[%s755_s9] sm:$0xf]  ;;  %s827_s9 = scalar_lea.vmem %s1382_s5, %s1145_s26 [#allocation4]  ;;  %s1152_s5 = sshll.u32 %s1372_s25, 5 }
 0x9d8   : > { %s1511_s18 = scalar_lea.vmem %s1575_s2, %s1152_s5  ;;  %s1308_s25 = smov 96  }
 0x9d9   : > { %1233 = vtanh.f32 %v634_v16  ;;  %v1135_v19 = vmul.f32 -1.442695, %v634_v16  ;;  %v757_v16 = vunpack.c.l.bf16 %v756_v15  ;;  %s462_s5 = scalar_lea.vmem %s1511_s18, %s1404_s19  ;;  %s534_s11 = scalar_lea.vmem %s1511_s18, %s1124_s23 }
 0x9da   : > { %s750_s19 = scalar_lea.vmem %s1511_s18, %s1137_s21  ;;  %s822_s15 = scalar_lea.vmem %s1511_s18, %s1141_s30 }
 0x9db   : > { %1235 = vpow2.f32 %v1135_v19 }
 0x9de   : > { %v632_v17 = vpop.f32.mrf.mxu0 }
 0x9df   : > { %v1234_v18 = vpop.eup %1233 }
 0x9e0   : > { %657 = vrot.lane.b32.xlu2 %v1234_v18, %s1306_s7 }
 0x9e1   : > { %v1236_v20 = vpop.eup %1235 }
 0x9e2   : > { %v638_v21 = vadd.f32 1.0, %v1236_v20 }
 0x9e4   : > { %1237 = vrcp.f32 %v638_v21  ;;  %v650_v27 = vand.u32 2147483648, %v638_v21  ;;  %vm644_vm3 = vweird.f32 %v638_v21  ;;  %v648_v28 = vand.u32 2147483647, %v638_v21 }
 0x9e6   : > { %v651_v30 = vor.u32 1.1754944e-38, %v650_v27  ;;  %vm649_vm5 = vcmp.eq.f32.partialorder %v648_v28, 8.507059e+37 }
 0x9ea   : > { %v1238_v22 = vpop.eup %1237 }
 0x9eb   : > { %v640_v23 = vmul.f32 %v1238_v22, %v638_v21  ;;  %vm645_vm2 = vweird.f32 %v1238_v22 }
 0x9ec   : > { %vm646_vm4 = vmor %vm644_vm3, %vm645_vm2  ;;  %vm389_vm3 = vcmask 257024  }
 0x9ed   : > { %v641_v24 = vsub.f32 1.0, %v640_v23 }
 0x9ef   : > { %v642_v25 = vmul.f32 %v1238_v22, %v641_v24 }
 0x9f1   : > { %v643_v26 = vadd.f32 %v1238_v22, %v642_v25 }
 0x9f3   : > { %v647_v29 = vsel %vm646_vm4, %v1238_v22, %v643_v26 }
 0x9f4   : > { %v652_v32 = vsel %vm649_vm5, %v651_v30, %v647_v29 }
 0x9f5   : > { %v655_v34 = vmul.f32 %v652_v32, %v593_v4 }
 0xa3a   : > { %v658_v31 = vpop.permute.xlu2 %657 }
 0xa3b   : > { %v660_v33 = vmul.f32 %v658_v31, %v652_v32 }
 0xa3d   : > { %662 = vrot.lane.b32.xlu0 %v660_v33, %s1307_s8 }
 0xaaf   : > { %v663_v35 = vpop.permute.xlu0 %662 }
 0xab0   : > { %v665_v36 = vadd.f32 %v663_v35, %v655_v34 }
 0xab2   : > { %1239 = vtanh.f32 %v665_v36 }
 0xab8   : > { %v1240_v37 = vpop.eup %1239 }
 0xab9   : > { %668 = vrot.lane.b32.xlu1 %v1240_v37, %s1306_s7 }
 0xb2b   : > { %v669_v38 = vpop.permute.xlu1 %668 }
 0xb2c   : > { %v671_v39 = vmul.f32 %v669_v38, %v652_v32 }
 0xb2e   : > { %v1459_v41 = vpack.c.bf16 %v671_v39, %v671_v39 }
 0xb30   : > { %v686_v43 = vunpack.c.l.b16 %v1459_v41 }
 0xb32   : > { %v687_v44 = vpack.c.b16 %v686_v43, %v686_v43 }
 0xb34   : > { %688 = vrot.lane.b32.xlu2 %v687_v44, %s1307_s8 }
 0xb8e   : > { %v689_v45 = vpop.permute.xlu2 %688 }
 0xb8f   : > { %1138 = vmatmul.msk.bf16.vlgmr.msrb.gmra.mxu1 %vm296_vm0, %v689_v45 }
 0xc0c   : > { %v702_v48 = vpop.f32.mrf.mxu1 }
 0xc0d   : > { %v706_v49 = vadd.f32 %v702_v48, %v685_v47 }
 0xc0f   : > { %1241 = vtanh.f32 %v706_v49  ;;  %v1139_v52 = vmul.f32 -1.442695, %v706_v49  ;;  %v828_v49 = vld [vmem:[%s827_s9] sm:$0xf]  ;;  %s388_s9 = scalar_lea.vmem %s1511_s18, %s1155_s4  ;;  %s606_s4 = scalar_lea.vmem %s1511_s18, %s1128_s28 }
 0xc11   : > { %1243 = vpow2.f32 %v1139_v52 }
 0xc14   : > { %v704_v50 = vpop.f32.mrf.mxu1 }
 0xc15   : > { %v1242_v51 = vpop.eup %1241  ;;  %v829_v50 = vunpack.c.l.bf16 %v828_v49 }
 0xc16   : > { %729 = vrot.lane.b32.xlu0 %v1242_v51, %s1306_s7 }
 0xc17   : > { %v1244_v53 = vpop.eup %1243 }
 0xc18   : > { %v710_v54 = vadd.f32 1.0, %v1244_v53 }
 0xc1a   : > { %1245 = vrcp.f32 %v710_v54  ;;  %v722_v60 = vand.u32 2147483648, %v710_v54  ;;  %vm716_vm7 = vweird.f32 %v710_v54  ;;  %v720_v61 = vand.u32 2147483647, %v710_v54 }
 0xc1c   : > { %v723_v63 = vor.u32 1.1754944e-38, %v722_v60  ;;  %vm721_vm9 = vcmp.eq.f32.partialorder %v720_v61, 8.507059e+37 }
 0xc20   : > { %v1246_v55 = vpop.eup %1245 }
 0xc21   : > { %v712_v56 = vmul.f32 %v1246_v55, %v710_v54  ;;  %vm717_vm6 = vweird.f32 %v1246_v55 }
 0xc22   : > { %vm718_vm8 = vmor %vm716_vm7, %vm717_vm6 }
 0xc23   : > { %v713_v57 = vsub.f32 1.0, %v712_v56 }
 0xc25   : > { %v714_v58 = vmul.f32 %v1246_v55, %v713_v57 }
 0xc27   : > { %v715_v59 = vadd.f32 %v1246_v55, %v714_v58 }
 0xc29   : > { %v719_v62 = vsel %vm718_vm8, %v1246_v55, %v715_v59 }
 0xc2a   : > { %v724_v1 = vsel %vm721_vm9, %v723_v63, %v719_v62 }
 0xc2b   : > { %v727_v3 = vmul.f32 %v724_v1, %v665_v36 }
 0xc88   : > { %v730_v0 = vpop.permute.xlu0 %729 }
 0xc89   : > { %v732_v2 = vmul.f32 %v730_v0, %v724_v1 }
 0xc8b   : > { %734 = vrot.lane.b32.xlu1 %v732_v2, %s1307_s8 }
 0xcfd   : > { %v735_v4 = vpop.permute.xlu1 %734 }
 0xcfe   : > { %v737_v5 = vadd.f32 %v735_v4, %v727_v3 }
 0xd00   : > { %1247 = vtanh.f32 %v737_v5 }
 0xd06   : > { %v1248_v6 = vpop.eup %1247 }
 0xd07   : > { %740 = vrot.lane.b32.xlu2 %v1248_v6, %s1306_s7 }
 0xd61   : > { %v741_v7 = vpop.permute.xlu2 %740 }
 0xd62   : > { %v743_v10 = vmul.f32 %v741_v7, %v724_v1 }
 0xd64   : > { %v1475_v11 = vpack.c.bf16 %v743_v10, %v743_v10 }
 0xd66   : > { %v758_v12 = vunpack.c.l.b16 %v1475_v11 }
 0xd68   : > { %v759_v13 = vpack.c.b16 %v758_v12, %v758_v12 }
 0xd6a   : > { %760 = vrot.lane.b32.xlu0 %v759_v13, %s1307_s8 }
 0xddc   : > { %v761_v14 = vpop.permute.xlu0 %760 }
 0xddd   : > { %1142 = vmatmul.msk.bf16.vlgmr.msrb.gmra.mxu2 %vm296_vm0, %v761_v14 }
 0xe60   : > { %v774_v17 = vpop.f32.mrf.mxu2 }
 0xe61   : > { %v778_v18 = vadd.f32 %v774_v17, %v757_v16 }
 0xe63   : > { %1249 = vtanh.f32 %v778_v18  ;;  %v1143_v21 = vmul.f32 -1.442695, %v778_v18 }
 0xe65   : > { %1251 = vpow2.f32 %v1143_v21 }
 0xe68   : > { %v776_v19 = vpop.f32.mrf.mxu2 }
 0xe69   : > { %v1250_v20 = vpop.eup %1249 }
 0xe6a   : > { %801 = vrot.lane.b32.xlu1 %v1250_v20, %s1306_s7 }
 0xe6b   : > { %v1252_v22 = vpop.eup %1251 }
 0xe6c   : > { %v782_v23 = vadd.f32 1.0, %v1252_v22 }
 0xe6e   : > { %1253 = vrcp.f32 %v782_v23  ;;  %v794_v29 = vand.u32 2147483648, %v782_v23  ;;  %vm788_vm11 = vweird.f32 %v782_v23  ;;  %v792_v30 = vand.u32 2147483647, %v782_v23 }
 0xe70   : > { %v795_v32 = vor.u32 1.1754944e-38, %v794_v29  ;;  %vm793_vm13 = vcmp.eq.f32.partialorder %v792_v30, 8.507059e+37 }
 0xe74   : > { %v1254_v24 = vpop.eup %1253 }
 0xe75   : > { %v784_v25 = vmul.f32 %v1254_v24, %v782_v23  ;;  %vm789_vm10 = vweird.f32 %v1254_v24 }
 0xe76   : > { %vm790_vm12 = vmor %vm788_vm11, %vm789_vm10 }
 0xe77   : > { %v785_v26 = vsub.f32 1.0, %v784_v25 }
 0xe79   : > { %v786_v27 = vmul.f32 %v1254_v24, %v785_v26 }
 0xe7b   : > { %v787_v28 = vadd.f32 %v1254_v24, %v786_v27 }
 0xe7d   : > { %v791_v31 = vsel %vm790_vm12, %v1254_v24, %v787_v28 }
 0xe7e   : > { %v796_v34 = vsel %vm793_vm13, %v795_v32, %v791_v31 }
 0xe7f   : > { %v799_v36 = vmul.f32 %v796_v34, %v737_v5 }
 0xedc   : > { %v802_v33 = vpop.permute.xlu1 %801 }
 0xedd   : > { %v804_v35 = vmul.f32 %v802_v33, %v796_v34 }
 0xedf   : > { %806 = vrot.lane.b32.xlu2 %v804_v35, %s1307_s8 }
 0xf39   : > { %v807_v37 = vpop.permute.xlu2 %806 }
 0xf3a   : > { %v809_v38 = vadd.f32 %v807_v37, %v799_v36 }
 0xf3c   : > { %1255 = vtanh.f32 %v809_v38 }
 0xf42   : > { %v1256_v39 = vpop.eup %1255 }
 0xf43   : > { %812 = vrot.lane.b32.xlu0 %v1256_v39, %s1306_s7 }
 0xfb5   : > { %v813_v43 = vpop.permute.xlu0 %812 }
 0xfb6   : > { %v815_v44 = vmul.f32 %v813_v43, %v796_v34 }
 0xfb8   : > { %v816_v45 = vpack.c.bf16 %v815_v44, %v815_v44 }
 0xfba   : > { %v830_v46 = vunpack.c.l.b16 %v816_v45 }
 0xfbc   : > { %v831_v47 = vpack.c.b16 %v830_v46, %v830_v46 }
 0xfbe   : > { %832 = vrot.lane.b32.xlu1 %v831_v47, %s1307_s8 }
0x1030   : > { %v833_v48 = vpop.permute.xlu1 %832 }
0x1031   : > { %1146 = vmatmul.msk.bf16.vlgmr.msrb.gmra.mxu3 %vm296_vm0, %v833_v48 }
0x10b4   : > { %v846_v51 = vpop.f32.mrf.mxu3 }
0x10b5   : > { %v850_v52 = vadd.f32 %v846_v51, %v829_v50 }
0x10b7   : > { %1257 = vtanh.f32 %v850_v52  ;;  %v1147_v55 = vmul.f32 -1.442695, %v850_v52 }
0x10b9   : > { %1259 = vpow2.f32 %v1147_v55 }
0x10bc   : > { %v848_v53 = vpop.f32.mrf.mxu3 }
0x10bd   : > { %v1258_v54 = vpop.eup %1257 }
0x10be   : > { %873 = vrot.lane.b32.xlu2 %v1258_v54, %s1306_s7 }
0x10bf   : > { %v1260_v56 = vpop.eup %1259 }
0x10c0   : > { %v854_v57 = vadd.f32 1.0, %v1260_v56 }
0x10c2   : > { %1261 = vrcp.f32 %v854_v57  ;;  %v866_v63 = vand.u32 2147483648, %v854_v57  ;;  %vm860_vm15 = vweird.f32 %v854_v57 }
0x10c4   : > { %v867_v0 = vor.u32 1.1754944e-38, %v866_v63 }
0x10c6   : > { %384 = vrot.lane.b32.xlu2 %v1391_v42, %s1307_s8  ;;  %v864_v42 = vand.u32 2147483647, %v854_v57 }
0x10c8   : > { %v1262_v58 = vpop.eup %1261  ;;  %vm865_vm2 = vcmp.eq.f32.partialorder %v864_v42, 8.507059e+37 }
0x10c9   : > { %v856_v59 = vmul.f32 %v1262_v58, %v854_v57  ;;  %vm861_vm14 = vweird.f32 %v1262_v58 }
0x10ca   : > { %vm862_vm1 = vmor %vm860_vm15, %vm861_vm14 }
0x10cb   : > { %v857_v60 = vsub.f32 1.0, %v856_v59 }
0x10cd   : > { %v858_v61 = vmul.f32 %v1262_v58, %v857_v60 }
0x10ce   : > { %602 = vrot.lane.b32.xlu2 %v1443_v8, %s1307_s8 }
0x10cf   : > { %v859_v62 = vadd.f32 %v1262_v58, %v858_v61 }
0x10d1   : > { %v863_v8 = vsel %vm862_vm1, %v1262_v58, %v859_v62 }
0x10d2   : > { %v868_v2 = vsel %vm865_vm2, %v867_v0, %v863_v8 }
0x10d3   : > { %v871_v5 = vmul.f32 %v868_v2, %v809_v38 }
0x10d6   : > { %818 = vrot.lane.b32.xlu2 %v816_v45, %s1307_s8 }
0x1118   : > { %v874_v1 = vpop.permute.xlu2 %873 }
0x1119   : > { %v876_v3 = vmul.f32 %v874_v1, %v868_v2 }
0x111b   : > { %878 = vrot.lane.b32.xlu0 %v876_v3, %s1307_s8 }
0x1120   : > { %v385_v4 = vpop.permute.xlu2 %384 }
0x1121   : > { %390 = vst.msk [vmem:[%s388_s9] sm:$0xf] %vm389_vm3, %v385_v4 }
0x1123   : > { %458 = vrot.lane.b32.xlu0 %v1411_v9, %s1307_s8 }
0x1128   : > { %v603_v9 = vpop.permute.xlu2 %602 }
0x112b   : > { %674 = vrot.lane.b32.xlu0 %v1459_v41, %s1307_s8 }
0x1130   : > { %v819_v41 = vpop.permute.xlu2 %818 }
0x118d   : > { %v879_v6 = vpop.permute.xlu0 %878 }
0x118e   : > { %v881_v7 = vadd.f32 %v879_v6, %v871_v5 }
0x1190   : > { %1263 = vtanh.f32 %v881_v7  ;;  %902 = vrot.lane.b32.xlu2 %v881_v7, %s1308_s25 }
0x1195   : > { %v459_v10 = vpop.permute.xlu0 %458 }
0x1196   : > { %v1264_v12 = vpop.eup %1263  ;;  %463 = vst.msk [vmem:[%s462_s5] sm:$0xf] %vm389_vm3, %v459_v10 }
0x1197   : > { %884 = vrot.lane.b32.xlu1 %v1264_v12, %s1306_s7  ;;  %s678_s7 = scalar_lea.vmem %s1511_s18, %s1133_s6 }
0x119f   : > { %530 = vrot.lane.b32.xlu1 %v1427_v40, %s1307_s8 }
0x11a7   : > { %746 = vrot.lane.b32.xlu1 %v1475_v11, %s1307_s8  ;;  %v675_v11 = vpop.permute.xlu0 %674 }
0x11ea   : > { %v903_v13 = vpop.permute.xlu2 %902 }
0x11eb   : > { %905 = vst.msk [vmem:[#allocation3] sm:$0xff] %vm296_vm0, %v903_v13 }
0x1209   : > { %v885_v14 = vpop.permute.xlu1 %884 }
0x120a   : > { %v887_v15 = vmul.f32 %v885_v14, %v868_v2 }
0x120c   : > { %v888_v16 = vpack.c.bf16 %v887_v15, %v887_v15  ;;  %897 = vrot.lane.b32.xlu1 %v887_v15, %s1307_s8 }
0x120e   : > { %890 = vrot.lane.b32.xlu0 %v888_v16, %s1307_s8  ;;  %s894_s8 = scalar_lea.vmem %s1511_s18, %s1145_s26 }
0x1211   : > { %v531_v40 = vpop.permute.xlu1 %530 }
0x1212   : > { %535 = vst.msk [vmem:[%s534_s11] sm:$0xf] %vm389_vm3, %v531_v40 }
0x1213   : > { %607 = vst.msk [vmem:[%s606_s4] sm:$0xf] %vm389_vm3, %v603_v9 }
0x1214   : > { %679 = vst.msk [vmem:[%s678_s7] sm:$0xf] %vm389_vm3, %v675_v11 }
0x1219   : > { %v747_v17 = vpop.permute.xlu1 %746 }
0x121a   : > { %751 = vst.msk [vmem:[%s750_s19] sm:$0xf] %vm389_vm3, %v747_v17 }
0x121b   : > { %823 = vst.msk [vmem:[%s822_s15] sm:$0xf] %vm389_vm3, %v819_v41 }
0x127e   : > { %v898_v18 = vpop.permute.xlu1 %897 }
0x127f   : > { %900 = vst.msk [vmem:[#allocation2] sm:$0xff] %vm296_vm0, %v898_v18 }
0x1280   : > { %v891_v19 = vpop.permute.xlu0 %890 }
0x1281   : > { %895 = vst.msk [vmem:[%s894_s8] sm:$0xf] %vm389_vm3, %v891_v19 }
0x1282 PF: > { %s12_s13 = sadd.s32 1, %s1303_s13   ;;  %s1576_s9 = smov %s1291_s10 }
0x1283   : > { %p9_p10 = scmp.ge.s32.totalorder %s12_s13, 4   ;;  %s1577_s10 = smov %s1359_s17 }
0x1284   : > { %s1578_s11 = smov %s1299_s12  ;;  %s1579_s12 = smov %s1581_s14 }
0x1285   :  { %11 = sbr.rel (!%p9_p10) target bundleno = 3 (0x3), region = 127 }

</bundles_post_ra>
